<compile_context>
chip_gen: v7x
topology: tpu7x:2x2x1
jax: 0.10.0
libtpu: 0.0.40
codegen_flags: <defaults>
</compile_context>

<pallas_src>
import functools

import jax
import jax.numpy as jnp
import numpy as np
from jax import lax
from jax.experimental import pallas as pl
from jax.experimental.pallas import tpu as pltpu

NUM_ASSETS = 30
NUM_OBS = 64       # T > N so the sample covariance is full rank (torch.inverse assumes this)
BATCH = 4          # independent return windows per pallas_call
_LANE = 128        # lane-dense (padded) output width


def _portfolio_kernel(returns_ref, out_ref, *, num_assets, num_obs,
                      risk_aversion, ridge):
    # ---- load one window of returns (T, N) ----------------------------------
    r = returns_ref[...].astype(jnp.float32)                          # (T, N)

    # ---- per-asset mean over time (torch: returns.mean(dim=0)) --------------
    mean_row = jnp.sum(r, axis=0, keepdims=True) * (1.0 / num_obs)    # (1, N)
    centered = r - mean_row                                           # (T, N)

    # ---- covariance (torch.cov(returns.T): unbiased, / (T-1)) on the MXU ----
    cov = lax.dot_general(centered, centered,
                          (((0,), (0,)), ((), ())),
                          preferred_element_type=jnp.float32) * (1.0 / (num_obs - 1))
    a = cov + ridge * jnp.eye(num_assets, dtype=jnp.float32)          # (N, N), SPD

    # ---- solve A x = mean directly (no explicit inverse) --------------------
    # Gauss-Jordan on the transposed augmented system aug = [A ; mean_row]
    # ((N+1) x N) using column elimination.  On exit aug[N, :] == x^T.
    aug = jnp.concatenate([a, mean_row], axis=0)                      # (N+1, N)
    lane = lax.broadcasted_iota(jnp.int32, (num_assets + 1, num_assets), 1)
    lane_row = lax.broadcasted_iota(jnp.int32, (1, num_assets), 1)

    for k in range(num_assets):                 # fully unrolled, k is static
        row_k = aug[k:k + 1, :]                                       # (1, N)   static sublane slice
        pivot = jnp.sum(jnp.where(lane_row == k, row_k, 0.0),
                        axis=1, keepdims=True)                        # (1, 1) == aug[k, k]
        col_k = jnp.sum(jnp.where(lane == k, aug, 0.0),
                        axis=1, keepdims=True)                        # (N+1, 1) == aug[:, k]
        col_norm = col_k * pl.reciprocal(pivot, approx=False)         # exact: error must not compound
        # Fold "set pivot column to col_norm" into the rank-1 update:
        row_adj = jnp.where(lane_row == k, pivot - 1.0, row_k)        # (1, N)
        aug = aug - col_norm * row_adj                                # (N+1, N)

    x_row = aug[num_assets:num_assets + 1, :]                         # (1, N) = (inv(A) @ mean)^T
    w = x_row * (1.0 / risk_aversion)

    # ---- softmax over assets (dim=0 of the torch vector) ---------------------
    # Exact division of the (1,1) denominator: an approximate reciprocal here
    # would put its full relative error into every output (rows would no
    # longer sum to 1).  Cost is one scalar divide -- negligible.
    w_max = jnp.max(w, axis=1, keepdims=True)
    e = jnp.exp(w - w_max)
    denom = jnp.sum(e, axis=1, keepdims=True)
    soft = e / denom

    # ---- lane-dense (padded to 128) store; wrapper strips the padding --------
    pad = out_ref.shape[-1] - num_assets
    if pad > 0:
        soft = jnp.concatenate([soft, jnp.zeros((1, pad), jnp.float32)], axis=1)
    out_ref[...] = soft


@functools.partial(jax.jit, static_argnames=("risk_aversion",))
def portfolio_forward_batched(returns_b, risk_aversion=0.1):
    """returns_b: (B, T, N) float32 -> (B, N) softmax-ed optimal weights."""
    b, num_obs, num_assets = returns_b.shape
    assert num_assets <= _LANE, "kernel assumes num_assets fits one lane vector"
    kernel = functools.partial(
        _portfolio_kernel,
        num_assets=num_assets,
        num_obs=num_obs,
        risk_aversion=float(risk_aversion),
        ridge=1e-6,
    )
    out = pl.pallas_call(
        kernel,
        out_shape=jax.ShapeDtypeStruct((b, 1, _LANE), jnp.float32),
        grid=(b,),
        in_specs=[pl.BlockSpec((None, num_obs, num_assets), lambda i: (i, 0, 0))],
        out_specs=pl.BlockSpec((None, 1, _LANE), lambda i: (i, 0, 0)),
        compiler_params=pltpu.CompilerParams(
            dimension_semantics=("parallel",)),   # v7x: 2 TCs split the batch
    )(returns_b.astype(jnp.float32))
    return out[:, 0, :num_assets]


def portfolio_forward(returns, risk_aversion=0.1):
    """Single-window forward, matching the torch module signature: (T, N) -> (N,)."""
    return portfolio_forward_batched(returns[None], risk_aversion=risk_aversion)[0]


def _reference_forward(returns, risk_aversion=0.1):
    """Pure-JAX replica of the torch forward (for verification)."""
    cov = jnp.cov(returns.T)                                          # (N, N), ddof=1
    inv = jnp.linalg.inv(cov + 1e-6 * jnp.eye(cov.shape[0], dtype=cov.dtype))
    optimal = inv @ returns.mean(axis=0) / risk_aversion
    return jax.nn.softmax(optimal, axis=0)


if __name__ == "__main__":
    key = jax.random.PRNGKey(0)
    k_param, k_data = jax.random.split(key)

    # nn.Parameter(torch.randn(num_assets)) -- unused in forward, kept for parity.
    _unused_weights = jax.random.normal(k_param, (NUM_ASSETS,), dtype=jnp.float32)

    returns_b = jax.random.normal(k_data, (BATCH, NUM_OBS, NUM_ASSETS), dtype=jnp.float32)

    # batched kernel call (grid over independent windows)
    out_b = jax.block_until_ready(portfolio_forward_batched(returns_b, risk_aversion=0.1))
    # single-window path (the original torch forward signature)
    out_single = jax.block_until_ready(portfolio_forward(returns_b[0], risk_aversion=0.1))

    ref_b = jax.vmap(lambda r: _reference_forward(r, 0.1))(returns_b)
    np.testing.assert_allclose(np.asarray(out_b), np.asarray(ref_b), rtol=1e-2, atol=1e-4)
    np.testing.assert_allclose(np.asarray(out_single), np.asarray(ref_b[0]), rtol=1e-2, atol=1e-4)
    assert out_b.shape == (BATCH, NUM_ASSETS)
    assert out_single.shape == (NUM_ASSETS,)
    # softmax rows must sum to 1 (exact division -> f32 rounding only)
    np.testing.assert_allclose(np.asarray(jnp.sum(out_b, axis=-1)),
                               np.ones(BATCH, dtype=np.float32), rtol=1e-3, atol=1e-4)

    print("KERNEL_OK")
</pallas_src>

<mosaic_0001>
module attributes {stable_mosaic.version = 11 : i64} {
  func.func @_portfolio_kernel(%arg0: i32, %arg1: memref<1x64x30xf32, #tpu.memory_space<vmem>>, %arg2: memref<1x1x128xf32, #tpu.memory_space<vmem>>) attributes {dimension_semantics = [#tpu.dimension_semantics<parallel>], iteration_bounds = array<i64: 4>, scalar_prefetch = 0 : i64, scratch_operands = 0 : i64, tpu.core_type = #tpu.core_type<tc>, window_params = [{transform_indices = @transform_0, window_bounds = array<i64: 1, 64, 30>}, {transform_indices = @transform_1, window_bounds = array<i64: 1, 1, 128>}]} {
    %c0 = arith.constant 0 : index
    %c0_0 = arith.constant 0 : index
    %c0_1 = arith.constant 0 : index
    %0 = vector.load %arg1[%c0, %c0_0, %c0_1] : memref<1x64x30xf32, #tpu.memory_space<vmem>>, vector<1x64x30xf32>
    %1 = vector.shape_cast %0 : vector<1x64x30xf32> to vector<64x30xf32>
    %cst = arith.constant dense<0.000000e+00> : vector<30xf32>
    %2 = vector.multi_reduction <add>, %1, %cst [0] : vector<64x30xf32> to vector<30xf32>
    %3 = vector.shape_cast %2 : vector<30xf32> to vector<1x30xf32>
    %cst_2 = arith.constant 1.562500e-02 : f32
    %4 = vector.broadcast %cst_2 : f32 to vector<1x30xf32>
    %5 = arith.mulf %3, %4 : vector<1x30xf32>
    %6 = vector.broadcast %5 : vector<1x30xf32> to vector<64x30xf32>
    %7 = arith.subf %1, %6 : vector<64x30xf32>
    %cst_3 = arith.constant dense<0.000000e+00> : vector<30x30xf32>
    %8 = tpu.matmul %7, %7, %cst_3 {dimension_numbers = #tpu.dot_dimension_numbers<[0], [0], [1], [1], [0, 1, 1, 1], [], []>} : vector<64x30xf32>, vector<64x30xf32>, vector<30x30xf32> -> vector<30x30xf32>
    %cst_4 = arith.constant 0.0158730168 : f32
    %9 = vector.broadcast %cst_4 : f32 to vector<30x30xf32>
    %10 = arith.mulf %8, %9 : vector<30x30xf32>
    %11 = tpu.iota {dimensions = array<i32: 0>} : vector<30x30xi32>
    %12 = tpu.iota {dimensions = array<i32: 1>} : vector<30x30xi32>
    %c0_i32 = arith.constant 0 : i32
    %13 = vector.broadcast %c0_i32 : i32 to vector<30x30xi32>
    %14 = arith.addi %11, %13 : vector<30x30xi32>
    %15 = arith.cmpi eq, %14, %12 : vector<30x30xi32>
    %16 = arith.extui %15 : vector<30x30xi1> to vector<30x30xi32>
    %17 = arith.sitofp %16 : vector<30x30xi32> to vector<30x30xf32>
    %cst_5 = arith.constant 9.99999997E-7 : f32
    %18 = vector.broadcast %cst_5 : f32 to vector<30x30xf32>
    %19 = arith.mulf %18, %17 : vector<30x30xf32>
    %20 = arith.addf %10, %19 : vector<30x30xf32>
    %21 = tpu.concatenate %20, %5 in 0 : vector<30x30xf32>, vector<1x30xf32> -> vector<31x30xf32>
    %22 = tpu.iota {dimensions = array<i32: 1>} : vector<31x30xi32>
    %23 = tpu.iota {dimensions = array<i32: 1>} : vector<1x30xi32>
    %24 = vector.extract_strided_slice %21 {offsets = [0, 0], sizes = [1, 30], strides = [1, 1]} : vector<31x30xf32> to vector<1x30xf32>
    %c0_i32_6 = arith.constant 0 : i32
    %25 = vector.broadcast %c0_i32_6 : i32 to vector<1x30xi32>
    %26 = arith.cmpi eq, %23, %25 : vector<1x30xi32>
    %cst_7 = arith.constant 0.000000e+00 : f32
    %27 = vector.broadcast %cst_7 : f32 to vector<1x30xf32>
    %28 = arith.select %26, %24, %27 : vector<1x30xi1>, vector<1x30xf32>
    %cst_8 = arith.constant dense<0.000000e+00> : vector<1xf32>
    %29 = vector.multi_reduction <add>, %28, %cst_8 [1] : vector<1x30xf32> to vector<1xf32>
    %30 = vector.shape_cast %29 : vector<1xf32> to vector<1x1xf32>
    %c0_i32_9 = arith.constant 0 : i32
    %31 = vector.broadcast %c0_i32_9 : i32 to vector<31x30xi32>
    %32 = arith.cmpi eq, %22, %31 : vector<31x30xi32>
    %cst_10 = arith.constant 0.000000e+00 : f32
    %33 = vector.broadcast %cst_10 : f32 to vector<31x30xf32>
    %34 = arith.select %32, %21, %33 : vector<31x30xi1>, vector<31x30xf32>
    %cst_11 = arith.constant dense<0.000000e+00> : vector<31xf32>
    %35 = vector.multi_reduction <add>, %34, %cst_11 [1] : vector<31x30xf32> to vector<31xf32>
    %36 = vector.shape_cast %35 : vector<31xf32> to vector<31x1xf32>
    %37 = tpu.reciprocal %30 : vector<1x1xf32> -> vector<1x1xf32>
    %38 = vector.broadcast %37 : vector<1x1xf32> to vector<31x1xf32>
    %39 = arith.mulf %36, %38 : vector<31x1xf32>
    %c0_i32_12 = arith.constant 0 : i32
    %40 = vector.broadcast %c0_i32_12 : i32 to vector<1x30xi32>
    %41 = arith.cmpi eq, %23, %40 : vector<1x30xi32>
    %cst_13 = arith.constant 1.000000e+00 : f32
    %42 = vector.broadcast %cst_13 : f32 to vector<1x1xf32>
    %43 = arith.subf %30, %42 : vector<1x1xf32>
    %44 = vector.shape_cast %43 : vector<1x1xf32> to vector<1x1xf32>
    %45 = vector.broadcast %44 : vector<1x1xf32> to vector<1x30xf32>
    %46 = arith.select %41, %45, %24 : vector<1x30xi1>, vector<1x30xf32>
    %47 = vector.broadcast %39 : vector<31x1xf32> to vector<31x30xf32>
    %48 = vector.broadcast %46 : vector<1x30xf32> to vector<31x30xf32>
    %49 = arith.mulf %47, %48 : vector<31x30xf32>
    %50 = arith.subf %21, %49 : vector<31x30xf32>
    %51 = vector.extract_strided_slice %50 {offsets = [1, 0], sizes = [1, 30], strides = [1, 1]} : vector<31x30xf32> to vector<1x30xf32>
    %c1_i32 = arith.constant 1 : i32
    %52 = vector.broadcast %c1_i32 : i32 to vector<1x30xi32>
    %53 = arith.cmpi eq, %23, %52 : vector<1x30xi32>
    %cst_14 = arith.constant 0.000000e+00 : f32
    %54 = vector.broadcast %cst_14 : f32 to vector<1x30xf32>
    %55 = arith.select %53, %51, %54 : vector<1x30xi1>, vector<1x30xf32>
    %cst_15 = arith.constant dense<0.000000e+00> : vector<1xf32>
    %56 = vector.multi_reduction <add>, %55, %cst_15 [1] : vector<1x30xf32> to vector<1xf32>
    %57 = vector.shape_cast %56 : vector<1xf32> to vector<1x1xf32>
    %c1_i32_16 = arith.constant 1 : i32
    %58 = vector.broadcast %c1_i32_16 : i32 to vector<31x30xi32>
    %59 = arith.cmpi eq, %22, %58 : vector<31x30xi32>
    %cst_17 = arith.constant 0.000000e+00 : f32
    %60 = vector.broadcast %cst_17 : f32 to vector<31x30xf32>
    %61 = arith.select %59, %50, %60 : vector<31x30xi1>, vector<31x30xf32>
    %cst_18 = arith.constant dense<0.000000e+00> : vector<31xf32>
    %62 = vector.multi_reduction <add>, %61, %cst_18 [1] : vector<31x30xf32> to vector<31xf32>
    %63 = vector.shape_cast %62 : vector<31xf32> to vector<31x1xf32>
    %64 = tpu.reciprocal %57 : vector<1x1xf32> -> vector<1x1xf32>
    %65 = vector.broadcast %64 : vector<1x1xf32> to vector<31x1xf32>
    %66 = arith.mulf %63, %65 : vector<31x1xf32>
    %c1_i32_19 = arith.constant 1 : i32
    %67 = vector.broadcast %c1_i32_19 : i32 to vector<1x30xi32>
    %68 = arith.cmpi eq, %23, %67 : vector<1x30xi32>
    %cst_20 = arith.constant 1.000000e+00 : f32
    %69 = vector.broadcast %cst_20 : f32 to vector<1x1xf32>
    %70 = arith.subf %57, %69 : vector<1x1xf32>
    %71 = vector.shape_cast %70 : vector<1x1xf32> to vector<1x1xf32>
    %72 = vector.broadcast %71 : vector<1x1xf32> to vector<1x30xf32>
    %73 = arith.select %68, %72, %51 : vector<1x30xi1>, vector<1x30xf32>
    %74 = vector.broadcast %66 : vector<31x1xf32> to vector<31x30xf32>
    %75 = vector.broadcast %73 : vector<1x30xf32> to vector<31x30xf32>
    %76 = arith.mulf %74, %75 : vector<31x30xf32>
    %77 = arith.subf %50, %76 : vector<31x30xf32>
    %78 = vector.extract_strided_slice %77 {offsets = [2, 0], sizes = [1, 30], strides = [1, 1]} : vector<31x30xf32> to vector<1x30xf32>
    %c2_i32 = arith.constant 2 : i32
    %79 = vector.broadcast %c2_i32 : i32 to vector<1x30xi32>
    %80 = arith.cmpi eq, %23, %79 : vector<1x30xi32>
    %cst_21 = arith.constant 0.000000e+00 : f32
    %81 = vector.broadcast %cst_21 : f32 to vector<1x30xf32>
    %82 = arith.select %80, %78, %81 : vector<1x30xi1>, vector<1x30xf32>
    %cst_22 = arith.constant dense<0.000000e+00> : vector<1xf32>
    %83 = vector.multi_reduction <add>, %82, %cst_22 [1] : vector<1x30xf32> to vector<1xf32>
    %84 = vector.shape_cast %83 : vector<1xf32> to vector<1x1xf32>
    %c2_i32_23 = arith.constant 2 : i32
    %85 = vector.broadcast %c2_i32_23 : i32 to vector<31x30xi32>
    %86 = arith.cmpi eq, %22, %85 : vector<31x30xi32>
    %cst_24 = arith.constant 0.000000e+00 : f32
    %87 = vector.broadcast %cst_24 : f32 to vector<31x30xf32>
    %88 = arith.select %86, %77, %87 : vector<31x30xi1>, vector<31x30xf32>
    %cst_25 = arith.constant dense<0.000000e+00> : vector<31xf32>
    %89 = vector.multi_reduction <add>, %88, %cst_25 [1] : vector<31x30xf32> to vector<31xf32>
    %90 = vector.shape_cast %89 : vector<31xf32> to vector<31x1xf32>
    %91 = tpu.reciprocal %84 : vector<1x1xf32> -> vector<1x1xf32>
    %92 = vector.broadcast %91 : vector<1x1xf32> to vector<31x1xf32>
    %93 = arith.mulf %90, %92 : vector<31x1xf32>
    %c2_i32_26 = arith.constant 2 : i32
    %94 = vector.broadcast %c2_i32_26 : i32 to vector<1x30xi32>
    %95 = arith.cmpi eq, %23, %94 : vector<1x30xi32>
    %cst_27 = arith.constant 1.000000e+00 : f32
    %96 = vector.broadcast %cst_27 : f32 to vector<1x1xf32>
    %97 = arith.subf %84, %96 : vector<1x1xf32>
    %98 = vector.shape_cast %97 : vector<1x1xf32> to vector<1x1xf32>
    %99 = vector.broadcast %98 : vector<1x1xf32> to vector<1x30xf32>
    %100 = arith.select %95, %99, %78 : vector<1x30xi1>, vector<1x30xf32>
    %101 = vector.broadcast %93 : vector<31x1xf32> to vector<31x30xf32>
    %102 = vector.broadcast %100 : vector<1x30xf32> to vector<31x30xf32>
    %103 = arith.mulf %101, %102 : vector<31x30xf32>
    %104 = arith.subf %77, %103 : vector<31x30xf32>
    %105 = vector.extract_strided_slice %104 {offsets = [3, 0], sizes = [1, 30], strides = [1, 1]} : vector<31x30xf32> to vector<1x30xf32>
    %c3_i32 = arith.constant 3 : i32
    %106 = vector.broadcast %c3_i32 : i32 to vector<1x30xi32>
    %107 = arith.cmpi eq, %23, %106 : vector<1x30xi32>
    %cst_28 = arith.constant 0.000000e+00 : f32
    %108 = vector.broadcast %cst_28 : f32 to vector<1x30xf32>
    %109 = arith.select %107, %105, %108 : vector<1x30xi1>, vector<1x30xf32>
    %cst_29 = arith.constant dense<0.000000e+00> : vector<1xf32>
    %110 = vector.multi_reduction <add>, %109, %cst_29 [1] : vector<1x30xf32> to vector<1xf32>
    %111 = vector.shape_cast %110 : vector<1xf32> to vector<1x1xf32>
    %c3_i32_30 = arith.constant 3 : i32
    %112 = vector.broadcast %c3_i32_30 : i32 to vector<31x30xi32>
    %113 = arith.cmpi eq, %22, %112 : vector<31x30xi32>
    %cst_31 = arith.constant 0.000000e+00 : f32
    %114 = vector.broadcast %cst_31 : f32 to vector<31x30xf32>
    %115 = arith.select %113, %104, %114 : vector<31x30xi1>, vector<31x30xf32>
    %cst_32 = arith.constant dense<0.000000e+00> : vector<31xf32>
    %116 = vector.multi_reduction <add>, %115, %cst_32 [1] : vector<31x30xf32> to vector<31xf32>
    %117 = vector.shape_cast %116 : vector<31xf32> to vector<31x1xf32>
    %118 = tpu.reciprocal %111 : vector<1x1xf32> -> vector<1x1xf32>
    %119 = vector.broadcast %118 : vector<1x1xf32> to vector<31x1xf32>
    %120 = arith.mulf %117, %119 : vector<31x1xf32>
    %c3_i32_33 = arith.constant 3 : i32
    %121 = vector.broadcast %c3_i32_33 : i32 to vector<1x30xi32>
    %122 = arith.cmpi eq, %23, %121 : vector<1x30xi32>
    %cst_34 = arith.constant 1.000000e+00 : f32
    %123 = vector.broadcast %cst_34 : f32 to vector<1x1xf32>
    %124 = arith.subf %111, %123 : vector<1x1xf32>
    %125 = vector.shape_cast %124 : vector<1x1xf32> to vector<1x1xf32>
    %126 = vector.broadcast %125 : vector<1x1xf32> to vector<1x30xf32>
    %127 = arith.select %122, %126, %105 : vector<1x30xi1>, vector<1x30xf32>
    %128 = vector.broadcast %120 : vector<31x1xf32> to vector<31x30xf32>
    %129 = vector.broadcast %127 : vector<1x30xf32> to vector<31x30xf32>
    %130 = arith.mulf %128, %129 : vector<31x30xf32>
    %131 = arith.subf %104, %130 : vector<31x30xf32>
    %132 = vector.extract_strided_slice %131 {offsets = [4, 0], sizes = [1, 30], strides = [1, 1]} : vector<31x30xf32> to vector<1x30xf32>
    %c4_i32 = arith.constant 4 : i32
    %133 = vector.broadcast %c4_i32 : i32 to vector<1x30xi32>
    %134 = arith.cmpi eq, %23, %133 : vector<1x30xi32>
    %cst_35 = arith.constant 0.000000e+00 : f32
    %135 = vector.broadcast %cst_35 : f32 to vector<1x30xf32>
    %136 = arith.select %134, %132, %135 : vector<1x30xi1>, vector<1x30xf32>
    %cst_36 = arith.constant dense<0.000000e+00> : vector<1xf32>
    %137 = vector.multi_reduction <add>, %136, %cst_36 [1] : vector<1x30xf32> to vector<1xf32>
    %138 = vector.shape_cast %137 : vector<1xf32> to vector<1x1xf32>
    %c4_i32_37 = arith.constant 4 : i32
    %139 = vector.broadcast %c4_i32_37 : i32 to vector<31x30xi32>
    %140 = arith.cmpi eq, %22, %139 : vector<31x30xi32>
    %cst_38 = arith.constant 0.000000e+00 : f32
    %141 = vector.broadcast %cst_38 : f32 to vector<31x30xf32>
    %142 = arith.select %140, %131, %141 : vector<31x30xi1>, vector<31x30xf32>
    %cst_39 = arith.constant dense<0.000000e+00> : vector<31xf32>
    %143 = vector.multi_reduction <add>, %142, %cst_39 [1] : vector<31x30xf32> to vector<31xf32>
    %144 = vector.shape_cast %143 : vector<31xf32> to vector<31x1xf32>
    %145 = tpu.reciprocal %138 : vector<1x1xf32> -> vector<1x1xf32>
    %146 = vector.broadcast %145 : vector<1x1xf32> to vector<31x1xf32>
    %147 = arith.mulf %144, %146 : vector<31x1xf32>
    %c4_i32_40 = arith.constant 4 : i32
    %148 = vector.broadcast %c4_i32_40 : i32 to vector<1x30xi32>
    %149 = arith.cmpi eq, %23, %148 : vector<1x30xi32>
    %cst_41 = arith.constant 1.000000e+00 : f32
    %150 = vector.broadcast %cst_41 : f32 to vector<1x1xf32>
    %151 = arith.subf %138, %150 : vector<1x1xf32>
    %152 = vector.shape_cast %151 : vector<1x1xf32> to vector<1x1xf32>
    %153 = vector.broadcast %152 : vector<1x1xf32> to vector<1x30xf32>
    %154 = arith.select %149, %153, %132 : vector<1x30xi1>, vector<1x30xf32>
    %155 = vector.broadcast %147 : vector<31x1xf32> to vector<31x30xf32>
    %156 = vector.broadcast %154 : vector<1x30xf32> to vector<31x30xf32>
    %157 = arith.mulf %155, %156 : vector<31x30xf32>
    %158 = arith.subf %131, %157 : vector<31x30xf32>
    %159 = vector.extract_strided_slice %158 {offsets = [5, 0], sizes = [1, 30], strides = [1, 1]} : vector<31x30xf32> to vector<1x30xf32>
    %c5_i32 = arith.constant 5 : i32
    %160 = vector.broadcast %c5_i32 : i32 to vector<1x30xi32>
    %161 = arith.cmpi eq, %23, %160 : vector<1x30xi32>
    %cst_42 = arith.constant 0.000000e+00 : f32
    %162 = vector.broadcast %cst_42 : f32 to vector<1x30xf32>
    %163 = arith.select %161, %159, %162 : vector<1x30xi1>, vector<1x30xf32>
    %cst_43 = arith.constant dense<0.000000e+00> : vector<1xf32>
    %164 = vector.multi_reduction <add>, %163, %cst_43 [1] : vector<1x30xf32> to vector<1xf32>
    %165 = vector.shape_cast %164 : vector<1xf32> to vector<1x1xf32>
    %c5_i32_44 = arith.constant 5 : i32
    %166 = vector.broadcast %c5_i32_44 : i32 to vector<31x30xi32>
    %167 = arith.cmpi eq, %22, %166 : vector<31x30xi32>
    %cst_45 = arith.constant 0.000000e+00 : f32
    %168 = vector.broadcast %cst_45 : f32 to vector<31x30xf32>
    %169 = arith.select %167, %158, %168 : vector<31x30xi1>, vector<31x30xf32>
    %cst_46 = arith.constant dense<0.000000e+00> : vector<31xf32>
    %170 = vector.multi_reduction <add>, %169, %cst_46 [1] : vector<31x30xf32> to vector<31xf32>
    %171 = vector.shape_cast %170 : vector<31xf32> to vector<31x1xf32>
    %172 = tpu.reciprocal %165 : vector<1x1xf32> -> vector<1x1xf32>
    %173 = vector.broadcast %172 : vector<1x1xf32> to vector<31x1xf32>
    %174 = arith.mulf %171, %173 : vector<31x1xf32>
    %c5_i32_47 = arith.constant 5 : i32
    %175 = vector.broadcast %c5_i32_47 : i32 to vector<1x30xi32>
    %176 = arith.cmpi eq, %23, %175 : vector<1x30xi32>
    %cst_48 = arith.constant 1.000000e+00 : f32
    %177 = vector.broadcast %cst_48 : f32 to vector<1x1xf32>
    %178 = arith.subf %165, %177 : vector<1x1xf32>
    %179 = vector.shape_cast %178 : vector<1x1xf32> to vector<1x1xf32>
    %180 = vector.broadcast %179 : vector<1x1xf32> to vector<1x30xf32>
    %181 = arith.select %176, %180, %159 : vector<1x30xi1>, vector<1x30xf32>
    %182 = vector.broadcast %174 : vector<31x1xf32> to vector<31x30xf32>
    %183 = vector.broadcast %181 : vector<1x30xf32> to vector<31x30xf32>
    %184 = arith.mulf %182, %183 : vector<31x30xf32>
    %185 = arith.subf %158, %184 : vector<31x30xf32>
    %186 = vector.extract_strided_slice %185 {offsets = [6, 0], sizes = [1, 30], strides = [1, 1]} : vector<31x30xf32> to vector<1x30xf32>
    %c6_i32 = arith.constant 6 : i32
    %187 = vector.broadcast %c6_i32 : i32 to vector<1x30xi32>
    %188 = arith.cmpi eq, %23, %187 : vector<1x30xi32>
    %cst_49 = arith.constant 0.000000e+00 : f32
    %189 = vector.broadcast %cst_49 : f32 to vector<1x30xf32>
    %190 = arith.select %188, %186, %189 : vector<1x30xi1>, vector<1x30xf32>
    %cst_50 = arith.constant dense<0.000000e+00> : vector<1xf32>
    %191 = vector.multi_reduction <add>, %190, %cst_50 [1] : vector<1x30xf32> to vector<1xf32>
    %192 = vector.shape_cast %191 : vector<1xf32> to vector<1x1xf32>
    %c6_i32_51 = arith.constant 6 : i32
    %193 = vector.broadcast %c6_i32_51 : i32 to vector<31x30xi32>
    %194 = arith.cmpi eq, %22, %193 : vector<31x30xi32>
    %cst_52 = arith.constant 0.000000e+00 : f32
    %195 = vector.broadcast %cst_52 : f32 to vector<31x30xf32>
    %196 = arith.select %194, %185, %195 : vector<31x30xi1>, vector<31x30xf32>
    %cst_53 = arith.constant dense<0.000000e+00> : vector<31xf32>
    %197 = vector.multi_reduction <add>, %196, %cst_53 [1] : vector<31x30xf32> to vector<31xf32>
    %198 = vector.shape_cast %197 : vector<31xf32> to vector<31x1xf32>
    %199 = tpu.reciprocal %192 : vector<1x1xf32> -> vector<1x1xf32>
    %200 = vector.broadcast %199 : vector<1x1xf32> to vector<31x1xf32>
    %201 = arith.mulf %198, %200 : vector<31x1xf32>
    %c6_i32_54 = arith.constant 6 : i32
    %202 = vector.broadcast %c6_i32_54 : i32 to vector<1x30xi32>
    %203 = arith.cmpi eq, %23, %202 : vector<1x30xi32>
    %cst_55 = arith.constant 1.000000e+00 : f32
    %204 = vector.broadcast %cst_55 : f32 to vector<1x1xf32>
    %205 = arith.subf %192, %204 : vector<1x1xf32>
    %206 = vector.shape_cast %205 : vector<1x1xf32> to vector<1x1xf32>
    %207 = vector.broadcast %206 : vector<1x1xf32> to vector<1x30xf32>
    %208 = arith.select %203, %207, %186 : vector<1x30xi1>, vector<1x30xf32>
    %209 = vector.broadcast %201 : vector<31x1xf32> to vector<31x30xf32>
    %210 = vector.broadcast %208 : vector<1x30xf32> to vector<31x30xf32>
    %211 = arith.mulf %209, %210 : vector<31x30xf32>
    %212 = arith.subf %185, %211 : vector<31x30xf32>
    %213 = vector.extract_strided_slice %212 {offsets = [7, 0], sizes = [1, 30], strides = [1, 1]} : vector<31x30xf32> to vector<1x30xf32>
    %c7_i32 = arith.constant 7 : i32
    %214 = vector.broadcast %c7_i32 : i32 to vector<1x30xi32>
    %215 = arith.cmpi eq, %23, %214 : vector<1x30xi32>
    %cst_56 = arith.constant 0.000000e+00 : f32
    %216 = vector.broadcast %cst_56 : f32 to vector<1x30xf32>
    %217 = arith.select %215, %213, %216 : vector<1x30xi1>, vector<1x30xf32>
    %cst_57 = arith.constant dense<0.000000e+00> : vector<1xf32>
    %218 = vector.multi_reduction <add>, %217, %cst_57 [1] : vector<1x30xf32> to vector<1xf32>
    %219 = vector.shape_cast %218 : vector<1xf32> to vector<1x1xf32>
    %c7_i32_58 = arith.constant 7 : i32
    %220 = vector.broadcast %c7_i32_58 : i32 to vector<31x30xi32>
    %221 = arith.cmpi eq, %22, %220 : vector<31x30xi32>
    %cst_59 = arith.constant 0.000000e+00 : f32
    %222 = vector.broadcast %cst_59 : f32 to vector<31x30xf32>
    %223 = arith.select %221, %212, %222 : vector<31x30xi1>, vector<31x30xf32>
    %cst_60 = arith.constant dense<0.000000e+00> : vector<31xf32>
    %224 = vector.multi_reduction <add>, %223, %cst_60 [1] : vector<31x30xf32> to vector<31xf32>
    %225 = vector.shape_cast %224 : vector<31xf32> to vector<31x1xf32>
    %226 = tpu.reciprocal %219 : vector<1x1xf32> -> vector<1x1xf32>
    %227 = vector.broadcast %226 : vector<1x1xf32> to vector<31x1xf32>
    %228 = arith.mulf %225, %227 : vector<31x1xf32>
    %c7_i32_61 = arith.constant 7 : i32
    %229 = vector.broadcast %c7_i32_61 : i32 to vector<1x30xi32>
    %230 = arith.cmpi eq, %23, %229 : vector<1x30xi32>
    %cst_62 = arith.constant 1.000000e+00 : f32
    %231 = vector.broadcast %cst_62 : f32 to vector<1x1xf32>
    %232 = arith.subf %219, %231 : vector<1x1xf32>
    %233 = vector.shape_cast %232 : vector<1x1xf32> to vector<1x1xf32>
    %234 = vector.broadcast %233 : vector<1x1xf32> to vector<1x30xf32>
    %235 = arith.select %230, %234, %213 : vector<1x30xi1>, vector<1x30xf32>
    %236 = vector.broadcast %228 : vector<31x1xf32> to vector<31x30xf32>
    %237 = vector.broadcast %235 : vector<1x30xf32> to vector<31x30xf32>
    %238 = arith.mulf %236, %237 : vector<31x30xf32>
    %239 = arith.subf %212, %238 : vector<31x30xf32>
    %240 = vector.extract_strided_slice %239 {offsets = [8, 0], sizes = [1, 30], strides = [1, 1]} : vector<31x30xf32> to vector<1x30xf32>
    %c8_i32 = arith.constant 8 : i32
    %241 = vector.broadcast %c8_i32 : i32 to vector<1x30xi32>
    %242 = arith.cmpi eq, %23, %241 : vector<1x30xi32>
    %cst_63 = arith.constant 0.000000e+00 : f32
    %243 = vector.broadcast %cst_63 : f32 to vector<1x30xf32>
    %244 = arith.select %242, %240, %243 : vector<1x30xi1>, vector<1x30xf32>
    %cst_64 = arith.constant dense<0.000000e+00> : vector<1xf32>
    %245 = vector.multi_reduction <add>, %244, %cst_64 [1] : vector<1x30xf32> to vector<1xf32>
    %246 = vector.shape_cast %245 : vector<1xf32> to vector<1x1xf32>
    %c8_i32_65 = arith.constant 8 : i32
    %247 = vector.broadcast %c8_i32_65 : i32 to vector<31x30xi32>
    %248 = arith.cmpi eq, %22, %247 : vector<31x30xi32>
    %cst_66 = arith.constant 0.000000e+00 : f32
    %249 = vector.broadcast %cst_66 : f32 to vector<31x30xf32>
    %250 = arith.select %248, %239, %249 : vector<31x30xi1>, vector<31x30xf32>
    %cst_67 = arith.constant dense<0.000000e+00> : vector<31xf32>
    %251 = vector.multi_reduction <add>, %250, %cst_67 [1] : vector<31x30xf32> to vector<31xf32>
    %252 = vector.shape_cast %251 : vector<31xf32> to vector<31x1xf32>
    %253 = tpu.reciprocal %246 : vector<1x1xf32> -> vector<1x1xf32>
    %254 = vector.broadcast %253 : vector<1x1xf32> to vector<31x1xf32>
    %255 = arith.mulf %252, %254 : vector<31x1xf32>
    %c8_i32_68 = arith.constant 8 : i32
    %256 = vector.broadcast %c8_i32_68 : i32 to vector<1x30xi32>
    %257 = arith.cmpi eq, %23, %256 : vector<1x30xi32>
    %cst_69 = arith.constant 1.000000e+00 : f32
    %258 = vector.broadcast %cst_69 : f32 to vector<1x1xf32>
    %259 = arith.subf %246, %258 : vector<1x1xf32>
    %260 = vector.shape_cast %259 : vector<1x1xf32> to vector<1x1xf32>
    %261 = vector.broadcast %260 : vector<1x1xf32> to vector<1x30xf32>
    %262 = arith.select %257, %261, %240 : vector<1x30xi1>, vector<1x30xf32>
    %263 = vector.broadcast %255 : vector<31x1xf32> to vector<31x30xf32>
    %264 = vector.broadcast %262 : vector<1x30xf32> to vector<31x30xf32>
    %265 = arith.mulf %263, %264 : vector<31x30xf32>
    %266 = arith.subf %239, %265 : vector<31x30xf32>
    %267 = vector.extract_strided_slice %266 {offsets = [9, 0], sizes = [1, 30], strides = [1, 1]} : vector<31x30xf32> to vector<1x30xf32>
    %c9_i32 = arith.constant 9 : i32
    %268 = vector.broadcast %c9_i32 : i32 to vector<1x30xi32>
    %269 = arith.cmpi eq, %23, %268 : vector<1x30xi32>
    %cst_70 = arith.constant 0.000000e+00 : f32
    %270 = vector.broadcast %cst_70 : f32 to vector<1x30xf32>
    %271 = arith.select %269, %267, %270 : vector<1x30xi1>, vector<1x30xf32>
    %cst_71 = arith.constant dense<0.000000e+00> : vector<1xf32>
    %272 = vector.multi_reduction <add>, %271, %cst_71 [1] : vector<1x30xf32> to vector<1xf32>
    %273 = vector.shape_cast %272 : vector<1xf32> to vector<1x1xf32>
    %c9_i32_72 = arith.constant 9 : i32
    %274 = vector.broadcast %c9_i32_72 : i32 to vector<31x30xi32>
    %275 = arith.cmpi eq, %22, %274 : vector<31x30xi32>
    %cst_73 = arith.constant 0.000000e+00 : f32
    %276 = vector.broadcast %cst_73 : f32 to vector<31x30xf32>
    %277 = arith.select %275, %266, %276 : vector<31x30xi1>, vector<31x30xf32>
    %cst_74 = arith.constant dense<0.000000e+00> : vector<31xf32>
    %278 = vector.multi_reduction <add>, %277, %cst_74 [1] : vector<31x30xf32> to vector<31xf32>
    %279 = vector.shape_cast %278 : vector<31xf32> to vector<31x1xf32>
    %280 = tpu.reciprocal %273 : vector<1x1xf32> -> vector<1x1xf32>
    %281 = vector.broadcast %280 : vector<1x1xf32> to vector<31x1xf32>
    %282 = arith.mulf %279, %281 : vector<31x1xf32>
    %c9_i32_75 = arith.constant 9 : i32
    %283 = vector.broadcast %c9_i32_75 : i32 to vector<1x30xi32>
    %284 = arith.cmpi eq, %23, %283 : vector<1x30xi32>
    %cst_76 = arith.constant 1.000000e+00 : f32
    %285 = vector.broadcast %cst_76 : f32 to vector<1x1xf32>
    %286 = arith.subf %273, %285 : vector<1x1xf32>
    %287 = vector.shape_cast %286 : vector<1x1xf32> to vector<1x1xf32>
    %288 = vector.broadcast %287 : vector<1x1xf32> to vector<1x30xf32>
    %289 = arith.select %284, %288, %267 : vector<1x30xi1>, vector<1x30xf32>
    %290 = vector.broadcast %282 : vector<31x1xf32> to vector<31x30xf32>
    %291 = vector.broadcast %289 : vector<1x30xf32> to vector<31x30xf32>
    %292 = arith.mulf %290, %291 : vector<31x30xf32>
    %293 = arith.subf %266, %292 : vector<31x30xf32>
    %294 = vector.extract_strided_slice %293 {offsets = [10, 0], sizes = [1, 30], strides = [1, 1]} : vector<31x30xf32> to vector<1x30xf32>
    %c10_i32 = arith.constant 10 : i32
    %295 = vector.broadcast %c10_i32 : i32 to vector<1x30xi32>
    %296 = arith.cmpi eq, %23, %295 : vector<1x30xi32>
    %cst_77 = arith.constant 0.000000e+00 : f32
    %297 = vector.broadcast %cst_77 : f32 to vector<1x30xf32>
    %298 = arith.select %296, %294, %297 : vector<1x30xi1>, vector<1x30xf32>
    %cst_78 = arith.constant dense<0.000000e+00> : vector<1xf32>
    %299 = vector.multi_reduction <add>, %298, %cst_78 [1] : vector<1x30xf32> to vector<1xf32>
    %300 = vector.shape_cast %299 : vector<1xf32> to vector<1x1xf32>
    %c10_i32_79 = arith.constant 10 : i32
    %301 = vector.broadcast %c10_i32_79 : i32 to vector<31x30xi32>
    %302 = arith.cmpi eq, %22, %301 : vector<31x30xi32>
    %cst_80 = arith.constant 0.000000e+00 : f32
    %303 = vector.broadcast %cst_80 : f32 to vector<31x30xf32>
    %304 = arith.select %302, %293, %303 : vector<31x30xi1>, vector<31x30xf32>
    %cst_81 = arith.constant dense<0.000000e+00> : vector<31xf32>
    %305 = vector.multi_reduction <add>, %304, %cst_81 [1] : vector<31x30xf32> to vector<31xf32>
    %306 = vector.shape_cast %305 : vector<31xf32> to vector<31x1xf32>
    %307 = tpu.reciprocal %300 : vector<1x1xf32> -> vector<1x1xf32>
    %308 = vector.broadcast %307 : vector<1x1xf32> to vector<31x1xf32>
    %309 = arith.mulf %306, %308 : vector<31x1xf32>
    %c10_i32_82 = arith.constant 10 : i32
    %310 = vector.broadcast %c10_i32_82 : i32 to vector<1x30xi32>
    %311 = arith.cmpi eq, %23, %310 : vector<1x30xi32>
    %cst_83 = arith.constant 1.000000e+00 : f32
    %312 = vector.broadcast %cst_83 : f32 to vector<1x1xf32>
    %313 = arith.subf %300, %312 : vector<1x1xf32>
    %314 = vector.shape_cast %313 : vector<1x1xf32> to vector<1x1xf32>
    %315 = vector.broadcast %314 : vector<1x1xf32> to vector<1x30xf32>
    %316 = arith.select %311, %315, %294 : vector<1x30xi1>, vector<1x30xf32>
    %317 = vector.broadcast %309 : vector<31x1xf32> to vector<31x30xf32>
    %318 = vector.broadcast %316 : vector<1x30xf32> to vector<31x30xf32>
    %319 = arith.mulf %317, %318 : vector<31x30xf32>
    %320 = arith.subf %293, %319 : vector<31x30xf32>
    %321 = vector.extract_strided_slice %320 {offsets = [11, 0], sizes = [1, 30], strides = [1, 1]} : vector<31x30xf32> to vector<1x30xf32>
    %c11_i32 = arith.constant 11 : i32
    %322 = vector.broadcast %c11_i32 : i32 to vector<1x30xi32>
    %323 = arith.cmpi eq, %23, %322 : vector<1x30xi32>
    %cst_84 = arith.constant 0.000000e+00 : f32
    %324 = vector.broadcast %cst_84 : f32 to vector<1x30xf32>
    %325 = arith.select %323, %321, %324 : vector<1x30xi1>, vector<1x30xf32>
    %cst_85 = arith.constant dense<0.000000e+00> : vector<1xf32>
    %326 = vector.multi_reduction <add>, %325, %cst_85 [1] : vector<1x30xf32> to vector<1xf32>
    %327 = vector.shape_cast %326 : vector<1xf32> to vector<1x1xf32>
    %c11_i32_86 = arith.constant 11 : i32
    %328 = vector.broadcast %c11_i32_86 : i32 to vector<31x30xi32>
    %329 = arith.cmpi eq, %22, %328 : vector<31x30xi32>
    %cst_87 = arith.constant 0.000000e+00 : f32
    %330 = vector.broadcast %cst_87 : f32 to vector<31x30xf32>
    %331 = arith.select %329, %320, %330 : vector<31x30xi1>, vector<31x30xf32>
    %cst_88 = arith.constant dense<0.000000e+00> : vector<31xf32>
    %332 = vector.multi_reduction <add>, %331, %cst_88 [1] : vector<31x30xf32> to vector<31xf32>
    %333 = vector.shape_cast %332 : vector<31xf32> to vector<31x1xf32>
    %334 = tpu.reciprocal %327 : vector<1x1xf32> -> vector<1x1xf32>
    %335 = vector.broadcast %334 : vector<1x1xf32> to vector<31x1xf32>
    %336 = arith.mulf %333, %335 : vector<31x1xf32>
    %c11_i32_89 = arith.constant 11 : i32
    %337 = vector.broadcast %c11_i32_89 : i32 to vector<1x30xi32>
    %338 = arith.cmpi eq, %23, %337 : vector<1x30xi32>
    %cst_90 = arith.constant 1.000000e+00 : f32
    %339 = vector.broadcast %cst_90 : f32 to vector<1x1xf32>
    %340 = arith.subf %327, %339 : vector<1x1xf32>
    %341 = vector.shape_cast %340 : vector<1x1xf32> to vector<1x1xf32>
    %342 = vector.broadcast %341 : vector<1x1xf32> to vector<1x30xf32>
    %343 = arith.select %338, %342, %321 : vector<1x30xi1>, vector<1x30xf32>
    %344 = vector.broadcast %336 : vector<31x1xf32> to vector<31x30xf32>
    %345 = vector.broadcast %343 : vector<1x30xf32> to vector<31x30xf32>
    %346 = arith.mulf %344, %345 : vector<31x30xf32>
    %347 = arith.subf %320, %346 : vector<31x30xf32>
    %348 = vector.extract_strided_slice %347 {offsets = [12, 0], sizes = [1, 30], strides = [1, 1]} : vector<31x30xf32> to vector<1x30xf32>
    %c12_i32 = arith.constant 12 : i32
    %349 = vector.broadcast %c12_i32 : i32 to vector<1x30xi32>
    %350 = arith.cmpi eq, %23, %349 : vector<1x30xi32>
    %cst_91 = arith.constant 0.000000e+00 : f32
    %351 = vector.broadcast %cst_91 : f32 to vector<1x30xf32>
    %352 = arith.select %350, %348, %351 : vector<1x30xi1>, vector<1x30xf32>
    %cst_92 = arith.constant dense<0.000000e+00> : vector<1xf32>
    %353 = vector.multi_reduction <add>, %352, %cst_92 [1] : vector<1x30xf32> to vector<1xf32>
    %354 = vector.shape_cast %353 : vector<1xf32> to vector<1x1xf32>
    %c12_i32_93 = arith.constant 12 : i32
    %355 = vector.broadcast %c12_i32_93 : i32 to vector<31x30xi32>
    %356 = arith.cmpi eq, %22, %355 : vector<31x30xi32>
    %cst_94 = arith.constant 0.000000e+00 : f32
    %357 = vector.broadcast %cst_94 : f32 to vector<31x30xf32>
    %358 = arith.select %356, %347, %357 : vector<31x30xi1>, vector<31x30xf32>
    %cst_95 = arith.constant dense<0.000000e+00> : vector<31xf32>
    %359 = vector.multi_reduction <add>, %358, %cst_95 [1] : vector<31x30xf32> to vector<31xf32>
    %360 = vector.shape_cast %359 : vector<31xf32> to vector<31x1xf32>
    %361 = tpu.reciprocal %354 : vector<1x1xf32> -> vector<1x1xf32>
    %362 = vector.broadcast %361 : vector<1x1xf32> to vector<31x1xf32>
    %363 = arith.mulf %360, %362 : vector<31x1xf32>
    %c12_i32_96 = arith.constant 12 : i32
    %364 = vector.broadcast %c12_i32_96 : i32 to vector<1x30xi32>
    %365 = arith.cmpi eq, %23, %364 : vector<1x30xi32>
    %cst_97 = arith.constant 1.000000e+00 : f32
    %366 = vector.broadcast %cst_97 : f32 to vector<1x1xf32>
    %367 = arith.subf %354, %366 : vector<1x1xf32>
    %368 = vector.shape_cast %367 : vector<1x1xf32> to vector<1x1xf32>
    %369 = vector.broadcast %368 : vector<1x1xf32> to vector<1x30xf32>
    %370 = arith.select %365, %369, %348 : vector<1x30xi1>, vector<1x30xf32>
    %371 = vector.broadcast %363 : vector<31x1xf32> to vector<31x30xf32>
    %372 = vector.broadcast %370 : vector<1x30xf32> to vector<31x30xf32>
    %373 = arith.mulf %371, %372 : vector<31x30xf32>
    %374 = arith.subf %347, %373 : vector<31x30xf32>
    %375 = vector.extract_strided_slice %374 {offsets = [13, 0], sizes = [1, 30], strides = [1, 1]} : vector<31x30xf32> to vector<1x30xf32>
    %c13_i32 = arith.constant 13 : i32
    %376 = vector.broadcast %c13_i32 : i32 to vector<1x30xi32>
    %377 = arith.cmpi eq, %23, %376 : vector<1x30xi32>
    %cst_98 = arith.constant 0.000000e+00 : f32
    %378 = vector.broadcast %cst_98 : f32 to vector<1x30xf32>
    %379 = arith.select %377, %375, %378 : vector<1x30xi1>, vector<1x30xf32>
    %cst_99 = arith.constant dense<0.000000e+00> : vector<1xf32>
    %380 = vector.multi_reduction <add>, %379, %cst_99 [1] : vector<1x30xf32> to vector<1xf32>
    %381 = vector.shape_cast %380 : vector<1xf32> to vector<1x1xf32>
    %c13_i32_100 = arith.constant 13 : i32
    %382 = vector.broadcast %c13_i32_100 : i32 to vector<31x30xi32>
    %383 = arith.cmpi eq, %22, %382 : vector<31x30xi32>
    %cst_101 = arith.constant 0.000000e+00 : f32
    %384 = vector.broadcast %cst_101 : f32 to vector<31x30xf32>
    %385 = arith.select %383, %374, %384 : vector<31x30xi1>, vector<31x30xf32>
    %cst_102 = arith.constant dense<0.000000e+00> : vector<31xf32>
    %386 = vector.multi_reduction <add>, %385, %cst_102 [1] : vector<31x30xf32> to vector<31xf32>
    %387 = vector.shape_cast %386 : vector<31xf32> to vector<31x1xf32>
    %388 = tpu.reciprocal %381 : vector<1x1xf32> -> vector<1x1xf32>
    %389 = vector.broadcast %388 : vector<1x1xf32> to vector<31x1xf32>
    %390 = arith.mulf %387, %389 : vector<31x1xf32>
    %c13_i32_103 = arith.constant 13 : i32
    %391 = vector.broadcast %c13_i32_103 : i32 to vector<1x30xi32>
    %392 = arith.cmpi eq, %23, %391 : vector<1x30xi32>
    %cst_104 = arith.constant 1.000000e+00 : f32
    %393 = vector.broadcast %cst_104 : f32 to vector<1x1xf32>
    %394 = arith.subf %381, %393 : vector<1x1xf32>
    %395 = vector.shape_cast %394 : vector<1x1xf32> to vector<1x1xf32>
    %396 = vector.broadcast %395 : vector<1x1xf32> to vector<1x30xf32>
    %397 = arith.select %392, %396, %375 : vector<1x30xi1>, vector<1x30xf32>
    %398 = vector.broadcast %390 : vector<31x1xf32> to vector<31x30xf32>
    %399 = vector.broadcast %397 : vector<1x30xf32> to vector<31x30xf32>
    %400 = arith.mulf %398, %399 : vector<31x30xf32>
    %401 = arith.subf %374, %400 : vector<31x30xf32>
    %402 = vector.extract_strided_slice %401 {offsets = [14, 0], sizes = [1, 30], strides = [1, 1]} : vector<31x30xf32> to vector<1x30xf32>
    %c14_i32 = arith.constant 14 : i32
    %403 = vector.broadcast %c14_i32 : i32 to vector<1x30xi32>
    %404 = arith.cmpi eq, %23, %403 : vector<1x30xi32>
    %cst_105 = arith.constant 0.000000e+00 : f32
    %405 = vector.broadcast %cst_105 : f32 to vector<1x30xf32>
    %406 = arith.select %404, %402, %405 : vector<1x30xi1>, vector<1x30xf32>
    %cst_106 = arith.constant dense<0.000000e+00> : vector<1xf32>
    %407 = vector.multi_reduction <add>, %406, %cst_106 [1] : vector<1x30xf32> to vector<1xf32>
    %408 = vector.shape_cast %407 : vector<1xf32> to vector<1x1xf32>
    %c14_i32_107 = arith.constant 14 : i32
    %409 = vector.broadcast %c14_i32_107 : i32 to vector<31x30xi32>
    %410 = arith.cmpi eq, %22, %409 : vector<31x30xi32>
    %cst_108 = arith.constant 0.000000e+00 : f32
    %411 = vector.broadcast %cst_108 : f32 to vector<31x30xf32>
    %412 = arith.select %410, %401, %411 : vector<31x30xi1>, vector<31x30xf32>
    %cst_109 = arith.constant dense<0.000000e+00> : vector<31xf32>
    %413 = vector.multi_reduction <add>, %412, %cst_109 [1] : vector<31x30xf32> to vector<31xf32>
    %414 = vector.shape_cast %413 : vector<31xf32> to vector<31x1xf32>
    %415 = tpu.reciprocal %408 : vector<1x1xf32> -> vector<1x1xf32>
    %416 = vector.broadcast %415 : vector<1x1xf32> to vector<31x1xf32>
    %417 = arith.mulf %414, %416 : vector<31x1xf32>
    %c14_i32_110 = arith.constant 14 : i32
    %418 = vector.broadcast %c14_i32_110 : i32 to vector<1x30xi32>
    %419 = arith.cmpi eq, %23, %418 : vector<1x30xi32>
    %cst_111 = arith.constant 1.000000e+00 : f32
    %420 = vector.broadcast %cst_111 : f32 to vector<1x1xf32>
    %421 = arith.subf %408, %420 : vector<1x1xf32>
    %422 = vector.shape_cast %421 : vector<1x1xf32> to vector<1x1xf32>
    %423 = vector.broadcast %422 : vector<1x1xf32> to vector<1x30xf32>
    %424 = arith.select %419, %423, %402 : vector<1x30xi1>, vector<1x30xf32>
    %425 = vector.broadcast %417 : vector<31x1xf32> to vector<31x30xf32>
    %426 = vector.broadcast %424 : vector<1x30xf32> to vector<31x30xf32>
    %427 = arith.mulf %425, %426 : vector<31x30xf32>
    %428 = arith.subf %401, %427 : vector<31x30xf32>
    %429 = vector.extract_strided_slice %428 {offsets = [15, 0], sizes = [1, 30], strides = [1, 1]} : vector<31x30xf32> to vector<1x30xf32>
    %c15_i32 = arith.constant 15 : i32
    %430 = vector.broadcast %c15_i32 : i32 to vector<1x30xi32>
    %431 = arith.cmpi eq, %23, %430 : vector<1x30xi32>
    %cst_112 = arith.constant 0.000000e+00 : f32
    %432 = vector.broadcast %cst_112 : f32 to vector<1x30xf32>
    %433 = arith.select %431, %429, %432 : vector<1x30xi1>, vector<1x30xf32>
    %cst_113 = arith.constant dense<0.000000e+00> : vector<1xf32>
    %434 = vector.multi_reduction <add>, %433, %cst_113 [1] : vector<1x30xf32> to vector<1xf32>
    %435 = vector.shape_cast %434 : vector<1xf32> to vector<1x1xf32>
    %c15_i32_114 = arith.constant 15 : i32
    %436 = vector.broadcast %c15_i32_114 : i32 to vector<31x30xi32>
    %437 = arith.cmpi eq, %22, %436 : vector<31x30xi32>
    %cst_115 = arith.constant 0.000000e+00 : f32
    %438 = vector.broadcast %cst_115 : f32 to vector<31x30xf32>
    %439 = arith.select %437, %428, %438 : vector<31x30xi1>, vector<31x30xf32>
    %cst_116 = arith.constant dense<0.000000e+00> : vector<31xf32>
    %440 = vector.multi_reduction <add>, %439, %cst_116 [1] : vector<31x30xf32> to vector<31xf32>
    %441 = vector.shape_cast %440 : vector<31xf32> to vector<31x1xf32>
    %442 = tpu.reciprocal %435 : vector<1x1xf32> -> vector<1x1xf32>
    %443 = vector.broadcast %442 : vector<1x1xf32> to vector<31x1xf32>
    %444 = arith.mulf %441, %443 : vector<31x1xf32>
    %c15_i32_117 = arith.constant 15 : i32
    %445 = vector.broadcast %c15_i32_117 : i32 to vector<1x30xi32>
    %446 = arith.cmpi eq, %23, %445 : vector<1x30xi32>
    %cst_118 = arith.constant 1.000000e+00 : f32
    %447 = vector.broadcast %cst_118 : f32 to vector<1x1xf32>
    %448 = arith.subf %435, %447 : vector<1x1xf32>
    %449 = vector.shape_cast %448 : vector<1x1xf32> to vector<1x1xf32>
    %450 = vector.broadcast %449 : vector<1x1xf32> to vector<1x30xf32>
    %451 = arith.select %446, %450, %429 : vector<1x30xi1>, vector<1x30xf32>
    %452 = vector.broadcast %444 : vector<31x1xf32> to vector<31x30xf32>
    %453 = vector.broadcast %451 : vector<1x30xf32> to vector<31x30xf32>
    %454 = arith.mulf %452, %453 : vector<31x30xf32>
    %455 = arith.subf %428, %454 : vector<31x30xf32>
    %456 = vector.extract_strided_slice %455 {offsets = [16, 0], sizes = [1, 30], strides = [1, 1]} : vector<31x30xf32> to vector<1x30xf32>
    %c16_i32 = arith.constant 16 : i32
    %457 = vector.broadcast %c16_i32 : i32 to vector<1x30xi32>
    %458 = arith.cmpi eq, %23, %457 : vector<1x30xi32>
    %cst_119 = arith.constant 0.000000e+00 : f32
    %459 = vector.broadcast %cst_119 : f32 to vector<1x30xf32>
    %460 = arith.select %458, %456, %459 : vector<1x30xi1>, vector<1x30xf32>
    %cst_120 = arith.constant dense<0.000000e+00> : vector<1xf32>
    %461 = vector.multi_reduction <add>, %460, %cst_120 [1] : vector<1x30xf32> to vector<1xf32>
    %462 = vector.shape_cast %461 : vector<1xf32> to vector<1x1xf32>
    %c16_i32_121 = arith.constant 16 : i32
    %463 = vector.broadcast %c16_i32_121 : i32 to vector<31x30xi32>
    %464 = arith.cmpi eq, %22, %463 : vector<31x30xi32>
    %cst_122 = arith.constant 0.000000e+00 : f32
    %465 = vector.broadcast %cst_122 : f32 to vector<31x30xf32>
    %466 = arith.select %464, %455, %465 : vector<31x30xi1>, vector<31x30xf32>
    %cst_123 = arith.constant dense<0.000000e+00> : vector<31xf32>
    %467 = vector.multi_reduction <add>, %466, %cst_123 [1] : vector<31x30xf32> to vector<31xf32>
    %468 = vector.shape_cast %467 : vector<31xf32> to vector<31x1xf32>
    %469 = tpu.reciprocal %462 : vector<1x1xf32> -> vector<1x1xf32>
    %470 = vector.broadcast %469 : vector<1x1xf32> to vector<31x1xf32>
    %471 = arith.mulf %468, %470 : vector<31x1xf32>
    %c16_i32_124 = arith.constant 16 : i32
    %472 = vector.broadcast %c16_i32_124 : i32 to vector<1x30xi32>
    %473 = arith.cmpi eq, %23, %472 : vector<1x30xi32>
    %cst_125 = arith.constant 1.000000e+00 : f32
    %474 = vector.broadcast %cst_125 : f32 to vector<1x1xf32>
    %475 = arith.subf %462, %474 : vector<1x1xf32>
    %476 = vector.shape_cast %475 : vector<1x1xf32> to vector<1x1xf32>
    %477 = vector.broadcast %476 : vector<1x1xf32> to vector<1x30xf32>
    %478 = arith.select %473, %477, %456 : vector<1x30xi1>, vector<1x30xf32>
    %479 = vector.broadcast %471 : vector<31x1xf32> to vector<31x30xf32>
    %480 = vector.broadcast %478 : vector<1x30xf32> to vector<31x30xf32>
    %481 = arith.mulf %479, %480 : vector<31x30xf32>
    %482 = arith.subf %455, %481 : vector<31x30xf32>
    %483 = vector.extract_strided_slice %482 {offsets = [17, 0], sizes = [1, 30], strides = [1, 1]} : vector<31x30xf32> to vector<1x30xf32>
    %c17_i32 = arith.constant 17 : i32
    %484 = vector.broadcast %c17_i32 : i32 to vector<1x30xi32>
    %485 = arith.cmpi eq, %23, %484 : vector<1x30xi32>
    %cst_126 = arith.constant 0.000000e+00 : f32
    %486 = vector.broadcast %cst_126 : f32 to vector<1x30xf32>
    %487 = arith.select %485, %483, %486 : vector<1x30xi1>, vector<1x30xf32>
    %cst_127 = arith.constant dense<0.000000e+00> : vector<1xf32>
    %488 = vector.multi_reduction <add>, %487, %cst_127 [1] : vector<1x30xf32> to vector<1xf32>
    %489 = vector.shape_cast %488 : vector<1xf32> to vector<1x1xf32>
    %c17_i32_128 = arith.constant 17 : i32
    %490 = vector.broadcast %c17_i32_128 : i32 to vector<31x30xi32>
    %491 = arith.cmpi eq, %22, %490 : vector<31x30xi32>
    %cst_129 = arith.constant 0.000000e+00 : f32
    %492 = vector.broadcast %cst_129 : f32 to vector<31x30xf32>
    %493 = arith.select %491, %482, %492 : vector<31x30xi1>, vector<31x30xf32>
    %cst_130 = arith.constant dense<0.000000e+00> : vector<31xf32>
    %494 = vector.multi_reduction <add>, %493, %cst_130 [1] : vector<31x30xf32> to vector<31xf32>
    %495 = vector.shape_cast %494 : vector<31xf32> to vector<31x1xf32>
    %496 = tpu.reciprocal %489 : vector<1x1xf32> -> vector<1x1xf32>
    %497 = vector.broadcast %496 : vector<1x1xf32> to vector<31x1xf32>
    %498 = arith.mulf %495, %497 : vector<31x1xf32>
    %c17_i32_131 = arith.constant 17 : i32
    %499 = vector.broadcast %c17_i32_131 : i32 to vector<1x30xi32>
    %500 = arith.cmpi eq, %23, %499 : vector<1x30xi32>
    %cst_132 = arith.constant 1.000000e+00 : f32
    %501 = vector.broadcast %cst_132 : f32 to vector<1x1xf32>
    %502 = arith.subf %489, %501 : vector<1x1xf32>
    %503 = vector.shape_cast %502 : vector<1x1xf32> to vector<1x1xf32>
    %504 = vector.broadcast %503 : vector<1x1xf32> to vector<1x30xf32>
    %505 = arith.select %500, %504, %483 : vector<1x30xi1>, vector<1x30xf32>
    %506 = vector.broadcast %498 : vector<31x1xf32> to vector<31x30xf32>
    %507 = vector.broadcast %505 : vector<1x30xf32> to vector<31x30xf32>
    %508 = arith.mulf %506, %507 : vector<31x30xf32>
    %509 = arith.subf %482, %508 : vector<31x30xf32>
    %510 = vector.extract_strided_slice %509 {offsets = [18, 0], sizes = [1, 30], strides = [1, 1]} : vector<31x30xf32> to vector<1x30xf32>
    %c18_i32 = arith.constant 18 : i32
    %511 = vector.broadcast %c18_i32 : i32 to vector<1x30xi32>
    %512 = arith.cmpi eq, %23, %511 : vector<1x30xi32>
    %cst_133 = arith.constant 0.000000e+00 : f32
    %513 = vector.broadcast %cst_133 : f32 to vector<1x30xf32>
    %514 = arith.select %512, %510, %513 : vector<1x30xi1>, vector<1x30xf32>
    %cst_134 = arith.constant dense<0.000000e+00> : vector<1xf32>
    %515 = vector.multi_reduction <add>, %514, %cst_134 [1] : vector<1x30xf32> to vector<1xf32>
    %516 = vector.shape_cast %515 : vector<1xf32> to vector<1x1xf32>
    %c18_i32_135 = arith.constant 18 : i32
    %517 = vector.broadcast %c18_i32_135 : i32 to vector<31x30xi32>
    %518 = arith.cmpi eq, %22, %517 : vector<31x30xi32>
    %cst_136 = arith.constant 0.000000e+00 : f32
    %519 = vector.broadcast %cst_136 : f32 to vector<31x30xf32>
    %520 = arith.select %518, %509, %519 : vector<31x30xi1>, vector<31x30xf32>
    %cst_137 = arith.constant dense<0.000000e+00> : vector<31xf32>
    %521 = vector.multi_reduction <add>, %520, %cst_137 [1] : vector<31x30xf32> to vector<31xf32>
    %522 = vector.shape_cast %521 : vector<31xf32> to vector<31x1xf32>
    %523 = tpu.reciprocal %516 : vector<1x1xf32> -> vector<1x1xf32>
    %524 = vector.broadcast %523 : vector<1x1xf32> to vector<31x1xf32>
    %525 = arith.mulf %522, %524 : vector<31x1xf32>
    %c18_i32_138 = arith.constant 18 : i32
    %526 = vector.broadcast %c18_i32_138 : i32 to vector<1x30xi32>
    %527 = arith.cmpi eq, %23, %526 : vector<1x30xi32>
    %cst_139 = arith.constant 1.000000e+00 : f32
    %528 = vector.broadcast %cst_139 : f32 to vector<1x1xf32>
    %529 = arith.subf %516, %528 : vector<1x1xf32>
    %530 = vector.shape_cast %529 : vector<1x1xf32> to vector<1x1xf32>
    %531 = vector.broadcast %530 : vector<1x1xf32> to vector<1x30xf32>
    %532 = arith.select %527, %531, %510 : vector<1x30xi1>, vector<1x30xf32>
    %533 = vector.broadcast %525 : vector<31x1xf32> to vector<31x30xf32>
    %534 = vector.broadcast %532 : vector<1x30xf32> to vector<31x30xf32>
    %535 = arith.mulf %533, %534 : vector<31x30xf32>
    %536 = arith.subf %509, %535 : vector<31x30xf32>
    %537 = vector.extract_strided_slice %536 {offsets = [19, 0], sizes = [1, 30], strides = [1, 1]} : vector<31x30xf32> to vector<1x30xf32>
    %c19_i32 = arith.constant 19 : i32
    %538 = vector.broadcast %c19_i32 : i32 to vector<1x30xi32>
    %539 = arith.cmpi eq, %23, %538 : vector<1x30xi32>
    %cst_140 = arith.constant 0.000000e+00 : f32
    %540 = vector.broadcast %cst_140 : f32 to vector<1x30xf32>
    %541 = arith.select %539, %537, %540 : vector<1x30xi1>, vector<1x30xf32>
    %cst_141 = arith.constant dense<0.000000e+00> : vector<1xf32>
    %542 = vector.multi_reduction <add>, %541, %cst_141 [1] : vector<1x30xf32> to vector<1xf32>
    %543 = vector.shape_cast %542 : vector<1xf32> to vector<1x1xf32>
    %c19_i32_142 = arith.constant 19 : i32
    %544 = vector.broadcast %c19_i32_142 : i32 to vector<31x30xi32>
    %545 = arith.cmpi eq, %22, %544 : vector<31x30xi32>
    %cst_143 = arith.constant 0.000000e+00 : f32
    %546 = vector.broadcast %cst_143 : f32 to vector<31x30xf32>
    %547 = arith.select %545, %536, %546 : vector<31x30xi1>, vector<31x30xf32>
    %cst_144 = arith.constant dense<0.000000e+00> : vector<31xf32>
    %548 = vector.multi_reduction <add>, %547, %cst_144 [1] : vector<31x30xf32> to vector<31xf32>
    %549 = vector.shape_cast %548 : vector<31xf32> to vector<31x1xf32>
    %550 = tpu.reciprocal %543 : vector<1x1xf32> -> vector<1x1xf32>
    %551 = vector.broadcast %550 : vector<1x1xf32> to vector<31x1xf32>
    %552 = arith.mulf %549, %551 : vector<31x1xf32>
    %c19_i32_145 = arith.constant 19 : i32
    %553 = vector.broadcast %c19_i32_145 : i32 to vector<1x30xi32>
    %554 = arith.cmpi eq, %23, %553 : vector<1x30xi32>
    %cst_146 = arith.constant 1.000000e+00 : f32
    %555 = vector.broadcast %cst_146 : f32 to vector<1x1xf32>
    %556 = arith.subf %543, %555 : vector<1x1xf32>
    %557 = vector.shape_cast %556 : vector<1x1xf32> to vector<1x1xf32>
    %558 = vector.broadcast %557 : vector<1x1xf32> to vector<1x30xf32>
    %559 = arith.select %554, %558, %537 : vector<1x30xi1>, vector<1x30xf32>
    %560 = vector.broadcast %552 : vector<31x1xf32> to vector<31x30xf32>
    %561 = vector.broadcast %559 : vector<1x30xf32> to vector<31x30xf32>
    %562 = arith.mulf %560, %561 : vector<31x30xf32>
    %563 = arith.subf %536, %562 : vector<31x30xf32>
    %564 = vector.extract_strided_slice %563 {offsets = [20, 0], sizes = [1, 30], strides = [1, 1]} : vector<31x30xf32> to vector<1x30xf32>
    %c20_i32 = arith.constant 20 : i32
    %565 = vector.broadcast %c20_i32 : i32 to vector<1x30xi32>
    %566 = arith.cmpi eq, %23, %565 : vector<1x30xi32>
    %cst_147 = arith.constant 0.000000e+00 : f32
    %567 = vector.broadcast %cst_147 : f32 to vector<1x30xf32>
    %568 = arith.select %566, %564, %567 : vector<1x30xi1>, vector<1x30xf32>
    %cst_148 = arith.constant dense<0.000000e+00> : vector<1xf32>
    %569 = vector.multi_reduction <add>, %568, %cst_148 [1] : vector<1x30xf32> to vector<1xf32>
    %570 = vector.shape_cast %569 : vector<1xf32> to vector<1x1xf32>
    %c20_i32_149 = arith.constant 20 : i32
    %571 = vector.broadcast %c20_i32_149 : i32 to vector<31x30xi32>
    %572 = arith.cmpi eq, %22, %571 : vector<31x30xi32>
    %cst_150 = arith.constant 0.000000e+00 : f32
    %573 = vector.broadcast %cst_150 : f32 to vector<31x30xf32>
    %574 = arith.select %572, %563, %573 : vector<31x30xi1>, vector<31x30xf32>
    %cst_151 = arith.constant dense<0.000000e+00> : vector<31xf32>
    %575 = vector.multi_reduction <add>, %574, %cst_151 [1] : vector<31x30xf32> to vector<31xf32>
    %576 = vector.shape_cast %575 : vector<31xf32> to vector<31x1xf32>
    %577 = tpu.reciprocal %570 : vector<1x1xf32> -> vector<1x1xf32>
    %578 = vector.broadcast %577 : vector<1x1xf32> to vector<31x1xf32>
    %579 = arith.mulf %576, %578 : vector<31x1xf32>
    %c20_i32_152 = arith.constant 20 : i32
    %580 = vector.broadcast %c20_i32_152 : i32 to vector<1x30xi32>
    %581 = arith.cmpi eq, %23, %580 : vector<1x30xi32>
    %cst_153 = arith.constant 1.000000e+00 : f32
    %582 = vector.broadcast %cst_153 : f32 to vector<1x1xf32>
    %583 = arith.subf %570, %582 : vector<1x1xf32>
    %584 = vector.shape_cast %583 : vector<1x1xf32> to vector<1x1xf32>
    %585 = vector.broadcast %584 : vector<1x1xf32> to vector<1x30xf32>
    %586 = arith.select %581, %585, %564 : vector<1x30xi1>, vector<1x30xf32>
    %587 = vector.broadcast %579 : vector<31x1xf32> to vector<31x30xf32>
    %588 = vector.broadcast %586 : vector<1x30xf32> to vector<31x30xf32>
    %589 = arith.mulf %587, %588 : vector<31x30xf32>
    %590 = arith.subf %563, %589 : vector<31x30xf32>
    %591 = vector.extract_strided_slice %590 {offsets = [21, 0], sizes = [1, 30], strides = [1, 1]} : vector<31x30xf32> to vector<1x30xf32>
    %c21_i32 = arith.constant 21 : i32
    %592 = vector.broadcast %c21_i32 : i32 to vector<1x30xi32>
    %593 = arith.cmpi eq, %23, %592 : vector<1x30xi32>
    %cst_154 = arith.constant 0.000000e+00 : f32
    %594 = vector.broadcast %cst_154 : f32 to vector<1x30xf32>
    %595 = arith.select %593, %591, %594 : vector<1x30xi1>, vector<1x30xf32>
    %cst_155 = arith.constant dense<0.000000e+00> : vector<1xf32>
    %596 = vector.multi_reduction <add>, %595, %cst_155 [1] : vector<1x30xf32> to vector<1xf32>
    %597 = vector.shape_cast %596 : vector<1xf32> to vector<1x1xf32>
    %c21_i32_156 = arith.constant 21 : i32
    %598 = vector.broadcast %c21_i32_156 : i32 to vector<31x30xi32>
    %599 = arith.cmpi eq, %22, %598 : vector<31x30xi32>
    %cst_157 = arith.constant 0.000000e+00 : f32
    %600 = vector.broadcast %cst_157 : f32 to vector<31x30xf32>
    %601 = arith.select %599, %590, %600 : vector<31x30xi1>, vector<31x30xf32>
    %cst_158 = arith.constant dense<0.000000e+00> : vector<31xf32>
    %602 = vector.multi_reduction <add>, %601, %cst_158 [1] : vector<31x30xf32> to vector<31xf32>
    %603 = vector.shape_cast %602 : vector<31xf32> to vector<31x1xf32>
    %604 = tpu.reciprocal %597 : vector<1x1xf32> -> vector<1x1xf32>
    %605 = vector.broadcast %604 : vector<1x1xf32> to vector<31x1xf32>
    %606 = arith.mulf %603, %605 : vector<31x1xf32>
    %c21_i32_159 = arith.constant 21 : i32
    %607 = vector.broadcast %c21_i32_159 : i32 to vector<1x30xi32>
    %608 = arith.cmpi eq, %23, %607 : vector<1x30xi32>
    %cst_160 = arith.constant 1.000000e+00 : f32
    %609 = vector.broadcast %cst_160 : f32 to vector<1x1xf32>
    %610 = arith.subf %597, %609 : vector<1x1xf32>
    %611 = vector.shape_cast %610 : vector<1x1xf32> to vector<1x1xf32>
    %612 = vector.broadcast %611 : vector<1x1xf32> to vector<1x30xf32>
    %613 = arith.select %608, %612, %591 : vector<1x30xi1>, vector<1x30xf32>
    %614 = vector.broadcast %606 : vector<31x1xf32> to vector<31x30xf32>
    %615 = vector.broadcast %613 : vector<1x30xf32> to vector<31x30xf32>
    %616 = arith.mulf %614, %615 : vector<31x30xf32>
    %617 = arith.subf %590, %616 : vector<31x30xf32>
    %618 = vector.extract_strided_slice %617 {offsets = [22, 0], sizes = [1, 30], strides = [1, 1]} : vector<31x30xf32> to vector<1x30xf32>
    %c22_i32 = arith.constant 22 : i32
    %619 = vector.broadcast %c22_i32 : i32 to vector<1x30xi32>
    %620 = arith.cmpi eq, %23, %619 : vector<1x30xi32>
    %cst_161 = arith.constant 0.000000e+00 : f32
    %621 = vector.broadcast %cst_161 : f32 to vector<1x30xf32>
    %622 = arith.select %620, %618, %621 : vector<1x30xi1>, vector<1x30xf32>
    %cst_162 = arith.constant dense<0.000000e+00> : vector<1xf32>
    %623 = vector.multi_reduction <add>, %622, %cst_162 [1] : vector<1x30xf32> to vector<1xf32>
    %624 = vector.shape_cast %623 : vector<1xf32> to vector<1x1xf32>
    %c22_i32_163 = arith.constant 22 : i32
    %625 = vector.broadcast %c22_i32_163 : i32 to vector<31x30xi32>
    %626 = arith.cmpi eq, %22, %625 : vector<31x30xi32>
    %cst_164 = arith.constant 0.000000e+00 : f32
    %627 = vector.broadcast %cst_164 : f32 to vector<31x30xf32>
    %628 = arith.select %626, %617, %627 : vector<31x30xi1>, vector<31x30xf32>
    %cst_165 = arith.constant dense<0.000000e+00> : vector<31xf32>
    %629 = vector.multi_reduction <add>, %628, %cst_165 [1] : vector<31x30xf32> to vector<31xf32>
    %630 = vector.shape_cast %629 : vector<31xf32> to vector<31x1xf32>
    %631 = tpu.reciprocal %624 : vector<1x1xf32> -> vector<1x1xf32>
    %632 = vector.broadcast %631 : vector<1x1xf32> to vector<31x1xf32>
    %633 = arith.mulf %630, %632 : vector<31x1xf32>
    %c22_i32_166 = arith.constant 22 : i32
    %634 = vector.broadcast %c22_i32_166 : i32 to vector<1x30xi32>
    %635 = arith.cmpi eq, %23, %634 : vector<1x30xi32>
    %cst_167 = arith.constant 1.000000e+00 : f32
    %636 = vector.broadcast %cst_167 : f32 to vector<1x1xf32>
    %637 = arith.subf %624, %636 : vector<1x1xf32>
    %638 = vector.shape_cast %637 : vector<1x1xf32> to vector<1x1xf32>
    %639 = vector.broadcast %638 : vector<1x1xf32> to vector<1x30xf32>
    %640 = arith.select %635, %639, %618 : vector<1x30xi1>, vector<1x30xf32>
    %641 = vector.broadcast %633 : vector<31x1xf32> to vector<31x30xf32>
    %642 = vector.broadcast %640 : vector<1x30xf32> to vector<31x30xf32>
    %643 = arith.mulf %641, %642 : vector<31x30xf32>
    %644 = arith.subf %617, %643 : vector<31x30xf32>
    %645 = vector.extract_strided_slice %644 {offsets = [23, 0], sizes = [1, 30], strides = [1, 1]} : vector<31x30xf32> to vector<1x30xf32>
    %c23_i32 = arith.constant 23 : i32
    %646 = vector.broadcast %c23_i32 : i32 to vector<1x30xi32>
    %647 = arith.cmpi eq, %23, %646 : vector<1x30xi32>
    %cst_168 = arith.constant 0.000000e+00 : f32
    %648 = vector.broadcast %cst_168 : f32 to vector<1x30xf32>
    %649 = arith.select %647, %645, %648 : vector<1x30xi1>, vector<1x30xf32>
    %cst_169 = arith.constant dense<0.000000e+00> : vector<1xf32>
    %650 = vector.multi_reduction <add>, %649, %cst_169 [1] : vector<1x30xf32> to vector<1xf32>
    %651 = vector.shape_cast %650 : vector<1xf32> to vector<1x1xf32>
    %c23_i32_170 = arith.constant 23 : i32
    %652 = vector.broadcast %c23_i32_170 : i32 to vector<31x30xi32>
    %653 = arith.cmpi eq, %22, %652 : vector<31x30xi32>
    %cst_171 = arith.constant 0.000000e+00 : f32
    %654 = vector.broadcast %cst_171 : f32 to vector<31x30xf32>
    %655 = arith.select %653, %644, %654 : vector<31x30xi1>, vector<31x30xf32>
    %cst_172 = arith.constant dense<0.000000e+00> : vector<31xf32>
    %656 = vector.multi_reduction <add>, %655, %cst_172 [1] : vector<31x30xf32> to vector<31xf32>
    %657 = vector.shape_cast %656 : vector<31xf32> to vector<31x1xf32>
    %658 = tpu.reciprocal %651 : vector<1x1xf32> -> vector<1x1xf32>
    %659 = vector.broadcast %658 : vector<1x1xf32> to vector<31x1xf32>
    %660 = arith.mulf %657, %659 : vector<31x1xf32>
    %c23_i32_173 = arith.constant 23 : i32
    %661 = vector.broadcast %c23_i32_173 : i32 to vector<1x30xi32>
    %662 = arith.cmpi eq, %23, %661 : vector<1x30xi32>
    %cst_174 = arith.constant 1.000000e+00 : f32
    %663 = vector.broadcast %cst_174 : f32 to vector<1x1xf32>
    %664 = arith.subf %651, %663 : vector<1x1xf32>
    %665 = vector.shape_cast %664 : vector<1x1xf32> to vector<1x1xf32>
    %666 = vector.broadcast %665 : vector<1x1xf32> to vector<1x30xf32>
    %667 = arith.select %662, %666, %645 : vector<1x30xi1>, vector<1x30xf32>
    %668 = vector.broadcast %660 : vector<31x1xf32> to vector<31x30xf32>
    %669 = vector.broadcast %667 : vector<1x30xf32> to vector<31x30xf32>
    %670 = arith.mulf %668, %669 : vector<31x30xf32>
    %671 = arith.subf %644, %670 : vector<31x30xf32>
    %672 = vector.extract_strided_slice %671 {offsets = [24, 0], sizes = [1, 30], strides = [1, 1]} : vector<31x30xf32> to vector<1x30xf32>
    %c24_i32 = arith.constant 24 : i32
    %673 = vector.broadcast %c24_i32 : i32 to vector<1x30xi32>
    %674 = arith.cmpi eq, %23, %673 : vector<1x30xi32>
    %cst_175 = arith.constant 0.000000e+00 : f32
    %675 = vector.broadcast %cst_175 : f32 to vector<1x30xf32>
    %676 = arith.select %674, %672, %675 : vector<1x30xi1>, vector<1x30xf32>
    %cst_176 = arith.constant dense<0.000000e+00> : vector<1xf32>
    %677 = vector.multi_reduction <add>, %676, %cst_176 [1] : vector<1x30xf32> to vector<1xf32>
    %678 = vector.shape_cast %677 : vector<1xf32> to vector<1x1xf32>
    %c24_i32_177 = arith.constant 24 : i32
    %679 = vector.broadcast %c24_i32_177 : i32 to vector<31x30xi32>
    %680 = arith.cmpi eq, %22, %679 : vector<31x30xi32>
    %cst_178 = arith.constant 0.000000e+00 : f32
    %681 = vector.broadcast %cst_178 : f32 to vector<31x30xf32>
    %682 = arith.select %680, %671, %681 : vector<31x30xi1>, vector<31x30xf32>
    %cst_179 = arith.constant dense<0.000000e+00> : vector<31xf32>
    %683 = vector.multi_reduction <add>, %682, %cst_179 [1] : vector<31x30xf32> to vector<31xf32>
    %684 = vector.shape_cast %683 : vector<31xf32> to vector<31x1xf32>
    %685 = tpu.reciprocal %678 : vector<1x1xf32> -> vector<1x1xf32>
    %686 = vector.broadcast %685 : vector<1x1xf32> to vector<31x1xf32>
    %687 = arith.mulf %684, %686 : vector<31x1xf32>
    %c24_i32_180 = arith.constant 24 : i32
    %688 = vector.broadcast %c24_i32_180 : i32 to vector<1x30xi32>
    %689 = arith.cmpi eq, %23, %688 : vector<1x30xi32>
    %cst_181 = arith.constant 1.000000e+00 : f32
    %690 = vector.broadcast %cst_181 : f32 to vector<1x1xf32>
    %691 = arith.subf %678, %690 : vector<1x1xf32>
    %692 = vector.shape_cast %691 : vector<1x1xf32> to vector<1x1xf32>
    %693 = vector.broadcast %692 : vector<1x1xf32> to vector<1x30xf32>
    %694 = arith.select %689, %693, %672 : vector<1x30xi1>, vector<1x30xf32>
    %695 = vector.broadcast %687 : vector<31x1xf32> to vector<31x30xf32>
    %696 = vector.broadcast %694 : vector<1x30xf32> to vector<31x30xf32>
    %697 = arith.mulf %695, %696 : vector<31x30xf32>
    %698 = arith.subf %671, %697 : vector<31x30xf32>
    %699 = vector.extract_strided_slice %698 {offsets = [25, 0], sizes = [1, 30], strides = [1, 1]} : vector<31x30xf32> to vector<1x30xf32>
    %c25_i32 = arith.constant 25 : i32
    %700 = vector.broadcast %c25_i32 : i32 to vector<1x30xi32>
    %701 = arith.cmpi eq, %23, %700 : vector<1x30xi32>
    %cst_182 = arith.constant 0.000000e+00 : f32
    %702 = vector.broadcast %cst_182 : f32 to vector<1x30xf32>
    %703 = arith.select %701, %699, %702 : vector<1x30xi1>, vector<1x30xf32>
    %cst_183 = arith.constant dense<0.000000e+00> : vector<1xf32>
    %704 = vector.multi_reduction <add>, %703, %cst_183 [1] : vector<1x30xf32> to vector<1xf32>
    %705 = vector.shape_cast %704 : vector<1xf32> to vector<1x1xf32>
    %c25_i32_184 = arith.constant 25 : i32
    %706 = vector.broadcast %c25_i32_184 : i32 to vector<31x30xi32>
    %707 = arith.cmpi eq, %22, %706 : vector<31x30xi32>
    %cst_185 = arith.constant 0.000000e+00 : f32
    %708 = vector.broadcast %cst_185 : f32 to vector<31x30xf32>
    %709 = arith.select %707, %698, %708 : vector<31x30xi1>, vector<31x30xf32>
    %cst_186 = arith.constant dense<0.000000e+00> : vector<31xf32>
    %710 = vector.multi_reduction <add>, %709, %cst_186 [1] : vector<31x30xf32> to vector<31xf32>
    %711 = vector.shape_cast %710 : vector<31xf32> to vector<31x1xf32>
    %712 = tpu.reciprocal %705 : vector<1x1xf32> -> vector<1x1xf32>
    %713 = vector.broadcast %712 : vector<1x1xf32> to vector<31x1xf32>
    %714 = arith.mulf %711, %713 : vector<31x1xf32>
    %c25_i32_187 = arith.constant 25 : i32
    %715 = vector.broadcast %c25_i32_187 : i32 to vector<1x30xi32>
    %716 = arith.cmpi eq, %23, %715 : vector<1x30xi32>
    %cst_188 = arith.constant 1.000000e+00 : f32
    %717 = vector.broadcast %cst_188 : f32 to vector<1x1xf32>
    %718 = arith.subf %705, %717 : vector<1x1xf32>
    %719 = vector.shape_cast %718 : vector<1x1xf32> to vector<1x1xf32>
    %720 = vector.broadcast %719 : vector<1x1xf32> to vector<1x30xf32>
    %721 = arith.select %716, %720, %699 : vector<1x30xi1>, vector<1x30xf32>
    %722 = vector.broadcast %714 : vector<31x1xf32> to vector<31x30xf32>
    %723 = vector.broadcast %721 : vector<1x30xf32> to vector<31x30xf32>
    %724 = arith.mulf %722, %723 : vector<31x30xf32>
    %725 = arith.subf %698, %724 : vector<31x30xf32>
    %726 = vector.extract_strided_slice %725 {offsets = [26, 0], sizes = [1, 30], strides = [1, 1]} : vector<31x30xf32> to vector<1x30xf32>
    %c26_i32 = arith.constant 26 : i32
    %727 = vector.broadcast %c26_i32 : i32 to vector<1x30xi32>
    %728 = arith.cmpi eq, %23, %727 : vector<1x30xi32>
    %cst_189 = arith.constant 0.000000e+00 : f32
    %729 = vector.broadcast %cst_189 : f32 to vector<1x30xf32>
    %730 = arith.select %728, %726, %729 : vector<1x30xi1>, vector<1x30xf32>
    %cst_190 = arith.constant dense<0.000000e+00> : vector<1xf32>
    %731 = vector.multi_reduction <add>, %730, %cst_190 [1] : vector<1x30xf32> to vector<1xf32>
    %732 = vector.shape_cast %731 : vector<1xf32> to vector<1x1xf32>
    %c26_i32_191 = arith.constant 26 : i32
    %733 = vector.broadcast %c26_i32_191 : i32 to vector<31x30xi32>
    %734 = arith.cmpi eq, %22, %733 : vector<31x30xi32>
    %cst_192 = arith.constant 0.000000e+00 : f32
    %735 = vector.broadcast %cst_192 : f32 to vector<31x30xf32>
    %736 = arith.select %734, %725, %735 : vector<31x30xi1>, vector<31x30xf32>
    %cst_193 = arith.constant dense<0.000000e+00> : vector<31xf32>
    %737 = vector.multi_reduction <add>, %736, %cst_193 [1] : vector<31x30xf32> to vector<31xf32>
    %738 = vector.shape_cast %737 : vector<31xf32> to vector<31x1xf32>
    %739 = tpu.reciprocal %732 : vector<1x1xf32> -> vector<1x1xf32>
    %740 = vector.broadcast %739 : vector<1x1xf32> to vector<31x1xf32>
    %741 = arith.mulf %738, %740 : vector<31x1xf32>
    %c26_i32_194 = arith.constant 26 : i32
    %742 = vector.broadcast %c26_i32_194 : i32 to vector<1x30xi32>
    %743 = arith.cmpi eq, %23, %742 : vector<1x30xi32>
    %cst_195 = arith.constant 1.000000e+00 : f32
    %744 = vector.broadcast %cst_195 : f32 to vector<1x1xf32>
    %745 = arith.subf %732, %744 : vector<1x1xf32>
    %746 = vector.shape_cast %745 : vector<1x1xf32> to vector<1x1xf32>
    %747 = vector.broadcast %746 : vector<1x1xf32> to vector<1x30xf32>
    %748 = arith.select %743, %747, %726 : vector<1x30xi1>, vector<1x30xf32>
    %749 = vector.broadcast %741 : vector<31x1xf32> to vector<31x30xf32>
    %750 = vector.broadcast %748 : vector<1x30xf32> to vector<31x30xf32>
    %751 = arith.mulf %749, %750 : vector<31x30xf32>
    %752 = arith.subf %725, %751 : vector<31x30xf32>
    %753 = vector.extract_strided_slice %752 {offsets = [27, 0], sizes = [1, 30], strides = [1, 1]} : vector<31x30xf32> to vector<1x30xf32>
    %c27_i32 = arith.constant 27 : i32
    %754 = vector.broadcast %c27_i32 : i32 to vector<1x30xi32>
    %755 = arith.cmpi eq, %23, %754 : vector<1x30xi32>
    %cst_196 = arith.constant 0.000000e+00 : f32
    %756 = vector.broadcast %cst_196 : f32 to vector<1x30xf32>
    %757 = arith.select %755, %753, %756 : vector<1x30xi1>, vector<1x30xf32>
    %cst_197 = arith.constant dense<0.000000e+00> : vector<1xf32>
    %758 = vector.multi_reduction <add>, %757, %cst_197 [1] : vector<1x30xf32> to vector<1xf32>
    %759 = vector.shape_cast %758 : vector<1xf32> to vector<1x1xf32>
    %c27_i32_198 = arith.constant 27 : i32
    %760 = vector.broadcast %c27_i32_198 : i32 to vector<31x30xi32>
    %761 = arith.cmpi eq, %22, %760 : vector<31x30xi32>
    %cst_199 = arith.constant 0.000000e+00 : f32
    %762 = vector.broadcast %cst_199 : f32 to vector<31x30xf32>
    %763 = arith.select %761, %752, %762 : vector<31x30xi1>, vector<31x30xf32>
    %cst_200 = arith.constant dense<0.000000e+00> : vector<31xf32>
    %764 = vector.multi_reduction <add>, %763, %cst_200 [1] : vector<31x30xf32> to vector<31xf32>
    %765 = vector.shape_cast %764 : vector<31xf32> to vector<31x1xf32>
    %766 = tpu.reciprocal %759 : vector<1x1xf32> -> vector<1x1xf32>
    %767 = vector.broadcast %766 : vector<1x1xf32> to vector<31x1xf32>
    %768 = arith.mulf %765, %767 : vector<31x1xf32>
    %c27_i32_201 = arith.constant 27 : i32
    %769 = vector.broadcast %c27_i32_201 : i32 to vector<1x30xi32>
    %770 = arith.cmpi eq, %23, %769 : vector<1x30xi32>
    %cst_202 = arith.constant 1.000000e+00 : f32
    %771 = vector.broadcast %cst_202 : f32 to vector<1x1xf32>
    %772 = arith.subf %759, %771 : vector<1x1xf32>
    %773 = vector.shape_cast %772 : vector<1x1xf32> to vector<1x1xf32>
    %774 = vector.broadcast %773 : vector<1x1xf32> to vector<1x30xf32>
    %775 = arith.select %770, %774, %753 : vector<1x30xi1>, vector<1x30xf32>
    %776 = vector.broadcast %768 : vector<31x1xf32> to vector<31x30xf32>
    %777 = vector.broadcast %775 : vector<1x30xf32> to vector<31x30xf32>
    %778 = arith.mulf %776, %777 : vector<31x30xf32>
    %779 = arith.subf %752, %778 : vector<31x30xf32>
    %780 = vector.extract_strided_slice %779 {offsets = [28, 0], sizes = [1, 30], strides = [1, 1]} : vector<31x30xf32> to vector<1x30xf32>
    %c28_i32 = arith.constant 28 : i32
    %781 = vector.broadcast %c28_i32 : i32 to vector<1x30xi32>
    %782 = arith.cmpi eq, %23, %781 : vector<1x30xi32>
    %cst_203 = arith.constant 0.000000e+00 : f32
    %783 = vector.broadcast %cst_203 : f32 to vector<1x30xf32>
    %784 = arith.select %782, %780, %783 : vector<1x30xi1>, vector<1x30xf32>
    %cst_204 = arith.constant dense<0.000000e+00> : vector<1xf32>
    %785 = vector.multi_reduction <add>, %784, %cst_204 [1] : vector<1x30xf32> to vector<1xf32>
    %786 = vector.shape_cast %785 : vector<1xf32> to vector<1x1xf32>
    %c28_i32_205 = arith.constant 28 : i32
    %787 = vector.broadcast %c28_i32_205 : i32 to vector<31x30xi32>
    %788 = arith.cmpi eq, %22, %787 : vector<31x30xi32>
    %cst_206 = arith.constant 0.000000e+00 : f32
    %789 = vector.broadcast %cst_206 : f32 to vector<31x30xf32>
    %790 = arith.select %788, %779, %789 : vector<31x30xi1>, vector<31x30xf32>
    %cst_207 = arith.constant dense<0.000000e+00> : vector<31xf32>
    %791 = vector.multi_reduction <add>, %790, %cst_207 [1] : vector<31x30xf32> to vector<31xf32>
    %792 = vector.shape_cast %791 : vector<31xf32> to vector<31x1xf32>
    %793 = tpu.reciprocal %786 : vector<1x1xf32> -> vector<1x1xf32>
    %794 = vector.broadcast %793 : vector<1x1xf32> to vector<31x1xf32>
    %795 = arith.mulf %792, %794 : vector<31x1xf32>
    %c28_i32_208 = arith.constant 28 : i32
    %796 = vector.broadcast %c28_i32_208 : i32 to vector<1x30xi32>
    %797 = arith.cmpi eq, %23, %796 : vector<1x30xi32>
    %cst_209 = arith.constant 1.000000e+00 : f32
    %798 = vector.broadcast %cst_209 : f32 to vector<1x1xf32>
    %799 = arith.subf %786, %798 : vector<1x1xf32>
    %800 = vector.shape_cast %799 : vector<1x1xf32> to vector<1x1xf32>
    %801 = vector.broadcast %800 : vector<1x1xf32> to vector<1x30xf32>
    %802 = arith.select %797, %801, %780 : vector<1x30xi1>, vector<1x30xf32>
    %803 = vector.broadcast %795 : vector<31x1xf32> to vector<31x30xf32>
    %804 = vector.broadcast %802 : vector<1x30xf32> to vector<31x30xf32>
    %805 = arith.mulf %803, %804 : vector<31x30xf32>
    %806 = arith.subf %779, %805 : vector<31x30xf32>
    %807 = vector.extract_strided_slice %806 {offsets = [29, 0], sizes = [1, 30], strides = [1, 1]} : vector<31x30xf32> to vector<1x30xf32>
    %c29_i32 = arith.constant 29 : i32
    %808 = vector.broadcast %c29_i32 : i32 to vector<1x30xi32>
    %809 = arith.cmpi eq, %23, %808 : vector<1x30xi32>
    %cst_210 = arith.constant 0.000000e+00 : f32
    %810 = vector.broadcast %cst_210 : f32 to vector<1x30xf32>
    %811 = arith.select %809, %807, %810 : vector<1x30xi1>, vector<1x30xf32>
    %cst_211 = arith.constant dense<0.000000e+00> : vector<1xf32>
    %812 = vector.multi_reduction <add>, %811, %cst_211 [1] : vector<1x30xf32> to vector<1xf32>
    %813 = vector.shape_cast %812 : vector<1xf32> to vector<1x1xf32>
    %c29_i32_212 = arith.constant 29 : i32
    %814 = vector.broadcast %c29_i32_212 : i32 to vector<31x30xi32>
    %815 = arith.cmpi eq, %22, %814 : vector<31x30xi32>
    %cst_213 = arith.constant 0.000000e+00 : f32
    %816 = vector.broadcast %cst_213 : f32 to vector<31x30xf32>
    %817 = arith.select %815, %806, %816 : vector<31x30xi1>, vector<31x30xf32>
    %cst_214 = arith.constant dense<0.000000e+00> : vector<31xf32>
    %818 = vector.multi_reduction <add>, %817, %cst_214 [1] : vector<31x30xf32> to vector<31xf32>
    %819 = vector.shape_cast %818 : vector<31xf32> to vector<31x1xf32>
    %820 = tpu.reciprocal %813 : vector<1x1xf32> -> vector<1x1xf32>
    %821 = vector.broadcast %820 : vector<1x1xf32> to vector<31x1xf32>
    %822 = arith.mulf %819, %821 : vector<31x1xf32>
    %c29_i32_215 = arith.constant 29 : i32
    %823 = vector.broadcast %c29_i32_215 : i32 to vector<1x30xi32>
    %824 = arith.cmpi eq, %23, %823 : vector<1x30xi32>
    %cst_216 = arith.constant 1.000000e+00 : f32
    %825 = vector.broadcast %cst_216 : f32 to vector<1x1xf32>
    %826 = arith.subf %813, %825 : vector<1x1xf32>
    %827 = vector.shape_cast %826 : vector<1x1xf32> to vector<1x1xf32>
    %828 = vector.broadcast %827 : vector<1x1xf32> to vector<1x30xf32>
    %829 = arith.select %824, %828, %807 : vector<1x30xi1>, vector<1x30xf32>
    %830 = vector.broadcast %822 : vector<31x1xf32> to vector<31x30xf32>
    %831 = vector.broadcast %829 : vector<1x30xf32> to vector<31x30xf32>
    %832 = arith.mulf %830, %831 : vector<31x30xf32>
    %833 = arith.subf %806, %832 : vector<31x30xf32>
    %834 = vector.extract_strided_slice %833 {offsets = [30, 0], sizes = [1, 30], strides = [1, 1]} : vector<31x30xf32> to vector<1x30xf32>
    %cst_217 = arith.constant 1.000000e+01 : f32
    %835 = vector.broadcast %cst_217 : f32 to vector<1x30xf32>
    %836 = arith.mulf %834, %835 : vector<1x30xf32>
    %cst_218 = arith.constant dense<0xFF800000> : vector<1xf32>
    %837 = vector.multi_reduction <maximumf>, %836, %cst_218 [1] : vector<1x30xf32> to vector<1xf32>
    %838 = vector.shape_cast %837 : vector<1xf32> to vector<1x1xf32>
    %839 = vector.broadcast %838 : vector<1x1xf32> to vector<1x30xf32>
    %840 = arith.subf %836, %839 : vector<1x30xf32>
    %841 = math.exp %840 : vector<1x30xf32>
    %cst_219 = arith.constant dense<0.000000e+00> : vector<1xf32>
    %842 = vector.multi_reduction <add>, %841, %cst_219 [1] : vector<1x30xf32> to vector<1xf32>
    %843 = vector.shape_cast %842 : vector<1xf32> to vector<1x1xf32>
    %844 = vector.broadcast %843 : vector<1x1xf32> to vector<1x30xf32>
    %845 = arith.divf %841, %844 : vector<1x30xf32>
    %cst_220 = arith.constant 0.000000e+00 : f32
    %846 = vector.broadcast %cst_220 : f32 to vector<1x98xf32>
    %847 = tpu.concatenate %845, %846 in 1 : vector<1x30xf32>, vector<1x98xf32> -> vector<1x128xf32>
    %c0_221 = arith.constant 0 : index
    %c0_222 = arith.constant 0 : index
    %c0_223 = arith.constant 0 : index
    %848 = vector.load %arg2[%c0_221, %c0_222, %c0_223] : memref<1x1x128xf32, #tpu.memory_space<vmem>>, vector<1x1x128xf32>
    %849 = vector.shape_cast %848 : vector<1x1x128xf32> to vector<1x128xf32>
    %850 = vector.shape_cast %847 : vector<1x128xf32> to vector<1x1x128xf32>
    tpu.vector_store %arg2[%c0_221, %c0_222, %c0_223], %850 {strides = array<i32>} : memref<1x1x128xf32, #tpu.memory_space<vmem>>, vector<1x1x128xf32>,
    return
  }
  func.func @transform_0(%arg0: i32) -> (i32, i32, i32) {
    %c0_i32 = arith.constant 0 : i32
    %c0_i32_0 = arith.constant 0 : i32
    %c0_i32_1 = arith.constant 0 : i32
    return %arg0, %c0_i32, %c0_i32_0 : i32, i32, i32
  }
  func.func @transform_1(%arg0: i32) -> (i32, i32, i32) {
    %c0_i32 = arith.constant 0 : i32
    %c0_i32_0 = arith.constant 0 : i32
    %c0_i32_1 = arith.constant 0 : i32
    return %arg0, %c0_i32, %c0_i32_0 : i32, i32, i32
  }
}

</mosaic_0001>

<bundles_post_ra>
// kernel: portfolio_forward_batched.1
= control target key start
LH: loop header
LB: loop body
LE: loop exit
PB: predicated region body
PF: predicated region fallthrough
CT: control target
= control target key end

     0   :  { %6 = vsyncpa [#allocation3], 0  ;;  %s2337_s0 = inlined_call_operand.vmem [shape: f32[4,64,30], index: 0, kind: input, shape index: {}]   ;;  %s2338_s1 = inlined_call_operand.hbm [shape: f32[4,1,128], index: 1, kind: output, shape index: {}]  }
   0x1   :  { %8 = vsyncpa [#allocation3 + $0x1], 0  ;;  %s1671_s6 = smov 0   ;;  %s1673_s7 = smov 0  }
   0x2   :  { %s1675_s8 = smov 0   ;;  %s1677_s9 = smov 0  }
   0x3 LB: > { %s1692_s10 = sadd.s32 4294967295, %s1657_s9   ;;  %s1385_s11 = sadd.s32 4294967294, %s1657_s9   ;;  %s1657_s9 = sphi %s1677_s9, %s2344_s9   ;;  %s1653_s8 = sphi %s1675_s8, %s2343_s8   ;;  %s1649_s7 = sphi %s1673_s7, %s2342_s7   ;;  %s1645_s6 = sphi %s1671_s6, %s2341_s6  }
   0x4   : > { %s1696_s12 = sadd.s32 1, %s1657_s9   ;;  %s47_s13 = sadd.s32 1, %s1653_s8 }
   0x5   : > { %s44_s14 = ssub.s32 %s1657_s9, %s1696_s12  ;;  %p57_p0 = scmp.ne.s32.totalorder %s1653_s8, %s1649_s7 }
   0x6   : > { %p45_p1 = scmp.eq.s32.totalorder %s44_s14, 0  ;;  %p58_p2 = scmp.eq.s32.totalorder %s1692_s10, 3 }
   0x7   : > { %p63_p3 = scmp.ne.s32.totalorder %s1649_s7, %s1645_s6  ;;  %p64_p4 = scmp.eq.s32.totalorder %s1385_s11, 3 }
   0x8   : > { %s1707_s15 = scalar_select %p45_p1, %s1653_s8, %s47_s13  }
   0x9   : > { %p1709_p5 = por %p58_p2, %p57_p0  ;;  %p1713_p6 = por %p64_p4, %p63_p3 }
   0xa   : > { %p1388_p7 = scmp.ge.s32.totalorder %s1657_s9, 1  ;;  %p90_p8 = scmp.lt.s32.totalorder %s1657_s9, 5 }
   0xc   : > { %p91_p9 = pnand %p1388_p7, %p90_p8 }
   0xd   : > { %p109_p10 = scmp.lt.s32.totalorder (!%p91_p9), %s1692_s10, 3  ;;  %vm122_vm0 = vcmask (!%p91_p9), 244736   ;;  %vm185_vm1 = vcmask (!%p91_p9), 523264   ;;  %v287_v46 = vlaneseq (!%p91_p9)  ;;  %v1659_v50 = vmov (!%p91_p9), 0.0   ;;  %s107_s23 = sand.u32 (!%p91_p9), 1, %s1649_s7  }
   0xe   : > { %94 = sbr.rel (%p91_p9) target bundleno = 5826 (0x16c2), region = 24  ;;  %vm318_vm7 = vcmask (!%p91_p9), 237568   ;;  %vm363_vm9 = vcmask (!%p91_p9), 238593   ;;  %vm407_vm11 = vcmask (!%p91_p9), 239618   ;;  %vm451_vm13 = vcmask (!%p91_p9), 240643   ;;  %s1429_s24 = sshll.u32 (!%p91_p9), %s1692_s10, 4 }
   0xf   : > { %v1742_v47 = vshrl.u32 (!%p91_p9), %v287_v46, 7  ;;  %v1745_v49 = vand.u32 (!%p91_p9), 127, %v287_v46  ;;  %vm314_vm14 = vcmask (!%p91_p9), 1045504   ;;  %vm334_vm15 = vcmask (!%p91_p9), 243712   ;;  %s108_s25 = scalar_lea.vmem (!%p91_p9), [#allocation2], %s107_s23  ;;  %s2294_s29 = scalar_lea.hbm (!%p91_p9), %s2338_s1, %s1429_s24 }
  0x10   : > { %s1330_s26 = sshll.u32 (!%p91_p9), %s108_s25, 4  ;;  %s1318_s30 = scalar_lea.sflag (!%p91_p9), [#allocation3], %s107_s23  ;;  %s2296_s26 = int_to_ptr.vmem [resolvable:$true] %s1330_s26 }
  0x11   : > { %v289_v48 = vadd.s32 (!%p91_p9), 8, %v1742_v47  ;;  %vm294_vm3 = vcmp.eq.s32.totalorder (!%p91_p9), %v1742_v47, %v1745_v49  ;;  %v291_v53 = vadd.s32 (!%p91_p9), 24, %v1742_v47  ;;  %v290_v54 = vadd.s32 (!%p91_p9), 16, %v1742_v47  ;;  %s1595_s2 = scalar_lea.vmem (!%p91_p9), %s2296_s26, 16  ;;  %s1660_s3 = smov (!%p91_p9), [#allocation2]  }
  0x12   : > { %v1395_v52 = vsel (!%p91_p9), %vm294_vm3, 1.0, %v1659_v50  ;;  %vm316_vm6 = vcmp.eq.s32.totalorder (!%p91_p9), %v1745_v49, 0  ;;  %vm361_vm8 = vcmp.eq.s32.totalorder (!%p91_p9), %v1745_v49, 1  ;;  %vm405_vm10 = vcmp.eq.s32.totalorder (!%p91_p9), %v1745_v49, 2  ;;  %p1596_p11 = scmp.ne.s32.totalorder (!%p91_p9), %s2296_s26, %s1595_s2  ;;  %s1599_s4 = sshll.u32 (!%p91_p9), %s1660_s3, 4  ;;  %s1600_s4 = int_to_ptr.vmem [resolvable:$false] %s1599_s4 }
  0x13   : > { %vm295_vm2 = vcmp.eq.s32.totalorder (!%p91_p9), %v289_v48, %v1745_v49  ;;  %v306_v57 = vmul.f32 (!%p91_p9), 1e-06, %v1395_v52  ;;  %vm297_vm4 = vcmp.eq.s32.totalorder (!%p91_p9), %v291_v53, %v1745_v49  ;;  %vm296_vm5 = vcmp.eq.s32.totalorder (!%p91_p9), %v290_v54, %v1745_v49  ;;  %s1601_s5 = scalar_lea.vmem (!%p91_p9), %s1600_s4, 32  ;;  %p1602_p0 = scmp.lt.s32.totalorder (!%p91_p9), %s2296_s26, %s1600_s4 }
  0x14   : > { %v1396_v51 = vsel (!%p91_p9), %vm295_vm2, 1.0, %v1659_v50  ;;  %v1398_v63 = vsel (!%p91_p9), %vm297_vm4, 1.0, %v1659_v50  ;;  %vm449_vm12 = vcmp.eq.s32.totalorder (!%p91_p9), %v1745_v49, 3  ;;  %vm495_vm2 = vcmask (!%p91_p9), 241668   ;;  %p1597_p12 = pnand (!%p91_p9), %p1596_p11, %p1709_p5  ;;  %p1603_p1 = scmp.lt.s32.totalorder (!%p91_p9), %s1601_s5, %s1595_s2 }
  0x15   : > { %s110_s18 = scalar_select %p109_p10, %s1692_s10, 3  ;;  %v307_v55 = vmul.f32 1e-06, %v1396_v51  ;;  %vm537_vm3 = vcmp.eq.s32.totalorder %v1745_v49, 5  ;;  %vm539_vm4 = vcmask 242693  }
  0x16   : > { %p1598_p13 = pneg %p1597_p12  ;;  %p1604_p2 = por %p1603_p1, %p1602_p0 }
  0x17   : > { %s1432_s19 = sshll.u32 %s110_s18, 6 }
  0x18   : > { %s113_s22 = scalar_lea.vmem %s2337_s0, %s1432_s19  ;;  %p1605_p3 = pnand %p1604_p2, %p1598_p13 }
  0x19   : > { %v114_v0 = vld [vmem:[%s113_s22] sm:$0xff]  ;;  %v115_v1 = vld [vmem:[%s113_s22 + $0x8] sm:$0xff]  ;;  %v116_v2 = vld [vmem:[%s113_s22 + $0x10] sm:$0xff] }
  0x1a   : > { %v117_v3 = vld [vmem:[%s113_s22 + $0x18] sm:$0xff]  ;;  %v123_v4 = vsel %vm122_vm0, %v114_v0, 0.0  ;;  %v124_v5 = vsel %vm122_vm0, %v115_v1, 0.0  ;;  %v126_v6 = vsel %vm122_vm0, %v116_v2, 0.0  ;;  %v118_v7 = vld [vmem:[%s113_s22 + $0x20] sm:$0xff]  ;;  %v119_v10 = vld [vmem:[%s113_s22 + $0x28] sm:$0xff] }
  0x1b   : > { %v125_v8 = vadd.f32 %v124_v5, %v123_v4  ;;  %v128_v9 = vsel %vm122_vm0, %v117_v3, 0.0  ;;  %v130_v12 = vsel %vm122_vm0, %v118_v7, 0.0  ;;  %v120_v13 = vld [vmem:[%s113_s22 + $0x30] sm:$0xff]  ;;  %v132_v15 = vsel %vm122_vm0, %v119_v10, 0.0  ;;  %v121_v16 = vld [vmem:[%s113_s22 + $0x38] sm:$0xff] }
  0x1c   : > { %v134_v18 = vsel %vm122_vm0, %v120_v13, 0.0  ;;  %v136_v20 = vsel %vm122_vm0, %v121_v16, 0.0 }
  0x1d   : > { %v127_v11 = vadd.f32 %v126_v6, %v125_v8 }
  0x1f   : > { %v129_v14 = vadd.f32 %v128_v9, %v127_v11 }
  0x21   : > { %v131_v17 = vadd.f32 %v130_v12, %v129_v14 }
  0x23   : > { %v133_v19 = vadd.f32 %v132_v15, %v131_v17 }
  0x25   : > { %v135_v21 = vadd.f32 %v134_v18, %v133_v19 }
  0x27   : > { %v137_v22 = vadd.f32 %v136_v20, %v135_v21 }
  0x29   : > { %v138_v23 = vrot.slane %v137_v22, 4 }
  0x2b   : > { %v139_v24 = vadd.f32 %v138_v23, %v137_v22 }
  0x2d   : > { %v140_v25 = vrot.slane %v139_v24, 2 }
  0x2f   : > { %v141_v26 = vadd.f32 %v140_v25, %v139_v24 }
  0x31   : > { %v142_v27 = vrot.slane %v141_v26, 1 }
  0x33   : > { %v143_v28 = vadd.f32 %v142_v27, %v141_v26 }
  0x35   : > { %v1732_v29 = vmul.f32 0.015625, %v143_v28 }
  0x37   : > { %v145_v30 = vsub.f32 %v114_v0, %v1732_v29  ;;  %v146_v31 = vsub.f32 %v115_v1, %v1732_v29  ;;  %v147_v32 = vsub.f32 %v116_v2, %v1732_v29  ;;  %v148_v33 = vsub.f32 %v117_v3, %v1732_v29 }
  0x38   : > { %v149_v36 = vsub.f32 %v118_v7, %v1732_v29  ;;  %v150_v37 = vsub.f32 %v119_v10, %v1732_v29  ;;  %v151_v39 = vsub.f32 %v120_v13, %v1732_v29  ;;  %v152_v40 = vsub.f32 %v121_v16, %v1732_v29 }
  0x39   : > { %153 = vxpose.xlu0.b32.start [1/8] (short) (narrow) %v145_v30, 32  ;;  %v1467_v34 = vpack.c.bf16 %v146_v31, %v145_v30  ;;  %v1471_v35 = vpack.c.bf16 %v148_v33, %v147_v32  ;;  %v1397_v0 = vsel %vm296_vm5, 1.0, %v1659_v50  ;;  %v309_v3 = vmul.f32 1e-06, %v1398_v63 }
  0x3a   : > { %v1475_v38 = vpack.c.bf16 %v150_v37, %v149_v36  ;;  %v1479_v41 = vpack.c.bf16 %v152_v40, %v151_v39  ;;  %v308_v5 = vmul.f32 1e-06, %v1397_v0  ;;  %v1768_v16 = vsub.s32 0, %v1742_v47 }
  0x3b   : > { %1468 = vmatprep.subr.bf16.mxu0 %v1467_v34  ;;  %1483 = vmatprep.subr.bf16.mxu1 %v1467_v34  ;;  %v1818_v63 = vsub.s32 2, %v1742_v47  ;;  %vm581_vm5 = vcmp.eq.s32.totalorder %v1745_v49, 6 }
  0x3c   : > { %1470 = vmatpush3.bf16.msra.mxu0 %v1467_v34  ;;  %1487 = vmatpush3.bf16.msra.mxu1 %v1467_v34 }
  0x3d   : > { %154 = vxpose.xlu0.b32.cont [2/8] (short) (narrow) %v146_v31, 32  ;;  %1472 = vmatprep.subr.bf16.mxu0 %v1471_v35 }
  0x3e   : > { %1484 = vmatprep.subr.bf16.mxu1 %v1471_v35 }
  0x40   : > { %1474 = vmatpush3.bf16.msra.mxu0 %v1471_v35  ;;  %1488 = vmatpush3.bf16.msra.mxu1 %v1471_v35 }
  0x41   : > { %155 = vxpose.xlu0.b32.cont [3/8] (short) (narrow) %v147_v32, 32  ;;  %1476 = vmatprep.subr.bf16.mxu0 %v1475_v38 }
  0x42   : > { %1485 = vmatprep.subr.bf16.mxu1 %v1475_v38 }
  0x44   : > { %1478 = vmatpush3.bf16.msra.mxu0 %v1475_v38  ;;  %1489 = vmatpush3.bf16.msra.mxu1 %v1475_v38 }
  0x45   : > { %156 = vxpose.xlu0.b32.cont [4/8] (short) (narrow) %v148_v33, 32  ;;  %1480 = vmatprep.subr.bf16.mxu0 %v1479_v41 }
  0x46   : > { %1486 = vmatprep.subr.bf16.mxu1 %v1479_v41 }
  0x48   : > { %1482 = vmatpush3.bf16.msra.mxu0 %v1479_v41  ;;  %1490 = vmatpush3.bf16.msra.mxu1 %v1479_v41 }
  0x49   : > { %157 = vxpose.xlu0.b32.cont [5/8] (short) (narrow) %v149_v36, 32 }
  0x4d   : > { %158 = vxpose.xlu0.b32.cont [6/8] (short) (narrow) %v150_v37, 32  ;;  %v1791_v37 = vsub.s32 1, %v1742_v47 }
  0x51   : > { %159 = vxpose.xlu0.b32.cont [7/8] (short) (narrow) %v151_v39, 32 }
  0x55   : > { %160 = vxpose.xlu0.b32.end [8/8] (short) (narrow) %v152_v40, 32 }
  0xb9   : > { %v169_v42 = vpop.trf.xlu0 }
  0xba   : > { %1461 = vmatprep.mubr.msk.f32.mxu0 %vm185_vm1, %v169_v42 }
  0xbd   : > { %v170_v43 = vpop.trf.xlu0 }
  0xbe   : > { %1462 = vmatmul.mubr.msk.f32.vlgmr.msra.gmra.mrb[0].mxu0 %vm185_vm1, %v170_v43 }
  0xc1   : > { %v171_v44 = vpop.trf.xlu0 }
  0xc2   : > { %1464 = vmatprep.mubr.msk.f32.mxu1 %vm185_vm1, %v171_v44 }
  0xc5   : > { %v172_v45 = vpop.trf.xlu0 }
  0xc6   : > { %1465 = vmatmul.mubr.msk.f32.vlgmr.msra.gmra.mrb[0].mxu1 %vm185_vm1, %v172_v45  ;;  %vm493_vm1 = vcmp.eq.s32.totalorder %v1745_v49, 4 }
 0x191   : > { %v1463_v56 = vpop.f32.mrb[0].mxu0 }
 0x192   : > { %v284_v58 = vmul.f32 0.015873017, %v1463_v56  ;;  %v264_v59 = vpop.f32.mrb[1].mxu0 }
 0x193   : > { %v283_v60 = vmul.f32 0.015873017, %v264_v59 }
 0x194   : > { %v311_v61 = vadd.f32 %v307_v55, %v284_v58 }
 0x195   : > { %v310_v62 = vadd.f32 %v306_v57, %v283_v60 }
 0x196   : > { %v322_v27 = vsel %vm316_vm6, %v311_v61, 0.0 }
 0x197   : > { %v317_v1 = vsel %vm316_vm6, %v310_v62, 0.0  ;;  %v328_v28 = vsel %vm122_vm0, %v322_v27, 0.0 }
 0x198   : > { %v319_v2 = vsel %vm318_vm7, %v317_v1, 0.0  ;;  %v325_v9 = vsel %vm122_vm0, %v317_v1, 0.0 }
 0x199   : > { %320 = vadd.xlane.f32.xlu1 %v319_v2  ;;  %v1466_v4 = vpop.f32.mrb[0].mxu1 }
 0x19a   : > { %v286_v6 = vmul.f32 0.015873017, %v1466_v4  ;;  %v274_v7 = vpop.f32.mrb[1].mxu1 }
 0x19b   : > { %v285_v8 = vmul.f32 0.015873017, %v274_v7 }
 0x19c   : > { %v1759_v10 = vadd.f32 %v309_v3, %v286_v6 }
 0x19d   : > { %326 = vadd.xlane.f32.xlu1 %v325_v9  ;;  %v1761_v11 = vadd.f32 %v308_v5, %v285_v8 }
 0x19f   : > { %v323_v12 = vsel %vm316_vm6, %v1761_v11, 0.0 }
 0x1a0   : > { %v331_v13 = vsel %vm122_vm0, %v323_v12, 0.0 }
 0x1a1   : > { %332 = vadd.xlane.f32.xlu0 %v331_v13 }
 0x226   : > { %v321_v14 = vpop.xlane.xlu1 %320 }
 0x227   : > { %1531 = vrcp.f32 %v321_v14  ;;  %v1399_v15 = vadd.f32 -1.0, %v321_v14 }
 0x229   : > { %v348_v18 = vsel %vm316_vm6, %v1399_v15, %v310_v62 }
 0x22a   : > { %v327_v20 = vpop.xlane.xlu1 %326  ;;  %v1776_v21 = vrot.slane %v348_v18, %v1768_v16 }
 0x22e   : > { %v333_v60 = vpop.xlane.xlu0 %332 }
 0x231   : > { %v1532_v17 = vpop.eup %1531 }
 0x232   : > { %v1773_v19 = vrot.slane %v1532_v17, %v1768_v16  ;;  %v315_v17 = vsel %vm314_vm14, %v1759_v10, %v1732_v29  ;;  %vm699_vm14 = vcmp.eq.s32.totalorder %v1745_v49, 9 }
 0x234   : > { %v343_v22 = vmul.f32 %v1773_v19, %v327_v20 }
 0x236   : > { %v353_v23 = vmul.f32 %v1776_v21, %v343_v22 }
 0x238   : > { %v357_v24 = vsub.f32 %v310_v62, %v353_v23  ;;  %v345_v62 = vmul.f32 %v1773_v19, %v333_v60 }
 0x23a   : > { %v362_v25 = vsel %vm361_vm8, %v357_v24, 0.0  ;;  %v355_v4 = vmul.f32 %v1776_v21, %v345_v62 }
 0x23b   : > { %v364_v26 = vsel %vm363_vm9, %v362_v25, 0.0  ;;  %v370_v30 = vsel %vm122_vm0, %v362_v25, 0.0 }
 0x23c   : > { %365 = vadd.xlane.f32.xlu1 %v364_v26  ;;  %v359_v9 = vsub.f32 %v1761_v11, %v355_v4  ;;  %v324_v11 = vsel %vm316_vm6, %v315_v17, 0.0  ;;  %vm583_vm6 = vcmask 243718  }
 0x23d   : > { %v335_v20 = vsel %vm334_vm15, %v324_v11, 0.0 }
 0x23e   : > { %v368_v14 = vsel %vm361_vm8, %v359_v9, 0.0 }
 0x23f   : > { %v376_v15 = vsel %vm122_vm0, %v368_v14, 0.0  ;;  %v1890_v14 = vsub.s32 4, %v1742_v47 }
 0x240   : > { %329 = vadd.xlane.f32.xlu1 %v328_v28 }
 0x244   : > { %371 = vadd.xlane.f32.xlu1 %v370_v30 }
 0x2c9   : > { %v366_v31 = vpop.xlane.xlu1 %365 }
 0x2ca   : > { %1533 = vrcp.f32 %v366_v31  ;;  %v1400_v34 = vadd.f32 -1.0, %v366_v31 }
 0x2cc   : > { %v392_v39 = vsel %vm361_vm8, %v1400_v34, %v357_v24  ;;  %v1853_v34 = vsub.s32 3, %v1742_v47 }
 0x2cd   : > { %v330_v32 = vpop.xlane.xlu1 %329  ;;  %v1802_v44 = vrot.slane %v392_v39, %v1791_v37 }
 0x2ce   : > { %v344_v33 = vmul.f32 %v1773_v19, %v330_v32 }
 0x2d0   : > { %v354_v35 = vmul.f32 %v1776_v21, %v344_v33 }
 0x2d1   : > { %v372_v43 = vpop.xlane.xlu1 %371 }
 0x2d2   : > { %v358_v36 = vsub.f32 %v311_v61, %v354_v35 }
 0x2d4   : > { %v1534_v38 = vpop.eup %1533  ;;  %v367_v40 = vsel %vm361_vm8, %v358_v36, 0.0 }
 0x2d5   : > { %v1798_v41 = vrot.slane %v1534_v38, %v1791_v37  ;;  %v373_v42 = vsel %vm122_vm0, %v367_v40, 0.0 }
 0x2d6   : > { %374 = vadd.xlane.f32.xlu1 %v373_v42 }
 0x2d7   : > { %v387_v45 = vmul.f32 %v1798_v41, %v372_v43 }
 0x2d9   : > { %v397_v46 = vmul.f32 %v1802_v44, %v387_v45 }
 0x2db   : > { %v401_v48 = vsub.f32 %v357_v24, %v397_v46 }
 0x2dd   : > { %v406_v50 = vsel %vm405_vm10, %v401_v48, 0.0 }
 0x2de   : > { %v408_v51 = vsel %vm407_vm11, %v406_v50, 0.0  ;;  %v414_v52 = vsel %vm122_vm0, %v406_v50, 0.0 }
 0x2df   : > { %409 = vadd.xlane.f32.xlu1 %v408_v51 }
 0x2e3   : > { %415 = vadd.xlane.f32.xlu1 %v414_v52 }
 0x363   : > { %v375_v53 = vpop.xlane.xlu1 %374 }
 0x364   : > { %v388_v54 = vmul.f32 %v1798_v41, %v375_v53 }
 0x366   : > { %v398_v55 = vmul.f32 %v1802_v44, %v388_v54 }
 0x368   : > { %v402_v56 = vsub.f32 %v358_v36, %v398_v55 }
 0x36a   : > { %v411_v57 = vsel %vm405_vm10, %v402_v56, 0.0 }
 0x36b   : > { %v417_v58 = vsel %vm122_vm0, %v411_v57, 0.0 }
 0x36c   : > { %418 = vadd.xlane.f32.xlu1 %v417_v58  ;;  %v410_v59 = vpop.xlane.xlu1 %409 }
 0x36d   : > { %1535 = vrcp.f32 %v410_v59  ;;  %v1401_v61 = vadd.f32 -1.0, %v410_v59 }
 0x36f   : > { %v436_v1 = vsel %vm405_vm10, %v1401_v61, %v401_v48 }
 0x370   : > { %v416_v3 = vpop.xlane.xlu1 %415  ;;  %v1827_v5 = vrot.slane %v436_v1, %v1818_v63 }
 0x377   : > { %v1536_v0 = vpop.eup %1535 }
 0x378   : > { %v1823_v2 = vrot.slane %v1536_v0, %v1818_v63 }
 0x37a   : > { %v431_v6 = vmul.f32 %v1823_v2, %v416_v3 }
 0x37c   : > { %v441_v7 = vmul.f32 %v1827_v5, %v431_v6 }
 0x37e   : > { %v445_v8 = vsub.f32 %v401_v48, %v441_v7 }
 0x380   : > { %v450_v12 = vsel %vm449_vm12, %v445_v8, 0.0 }
 0x381   : > { %v452_v13 = vsel %vm451_vm13, %v450_v12, 0.0  ;;  %v458_v18 = vsel %vm122_vm0, %v450_v12, 0.0 }
 0x382   : > { %453 = vadd.xlane.f32.xlu1 %v452_v13 }
 0x386   : > { %377 = vadd.xlane.f32.xlu1 %v376_v15 }
 0x38a   : > { %459 = vadd.xlane.f32.xlu1 %v458_v18 }
 0x38e   : > { %336 = vadd.xlane.f32.xlu1 %v335_v20 }
 0x3f9   : > { %v419_v22 = vpop.xlane.xlu1 %418 }
 0x3fa   : > { %v432_v23 = vmul.f32 %v1823_v2, %v419_v22 }
 0x3fc   : > { %v442_v24 = vmul.f32 %v1827_v5, %v432_v23 }
 0x3fe   : > { %v446_v25 = vsub.f32 %v402_v56, %v442_v24 }
 0x400   : > { %v455_v26 = vsel %vm449_vm12, %v446_v25, 0.0 }
 0x401   : > { %v461_v29 = vsel %vm122_vm0, %v455_v26, 0.0 }
 0x402   : > { %462 = vadd.xlane.f32.xlu1 %v461_v29 }
 0x40f   : > { %v454_v10 = vpop.xlane.xlu1 %453 }
 0x410   : > { %1537 = vrcp.f32 %v454_v10  ;;  %v1402_v30 = vadd.f32 -1.0, %v454_v10 }
 0x412   : > { %v480_v36 = vsel %vm449_vm12, %v1402_v30, %v445_v8 }
 0x413   : > { %v378_v27 = vpop.xlane.xlu1 %377  ;;  %v1864_v43 = vrot.slane %v480_v36, %v1853_v34 }
 0x414   : > { %v389_v28 = vmul.f32 %v1798_v41, %v378_v27 }
 0x416   : > { %v399_v31 = vmul.f32 %v1802_v44, %v389_v28 }
 0x417   : > { %v460_v32 = vpop.xlane.xlu1 %459 }
 0x418   : > { %v403_v33 = vsub.f32 %v359_v9, %v399_v31 }
 0x41a   : > { %v1538_v35 = vpop.eup %1537  ;;  %v412_v38 = vsel %vm405_vm10, %v403_v33, 0.0 }
 0x41b   : > { %v1860_v39 = vrot.slane %v1538_v35, %v1853_v34  ;;  %v337_v40 = vpop.xlane.xlu1 %336  ;;  %v420_v42 = vsel %vm122_vm0, %v412_v38, 0.0 }
 0x41c   : > { %421 = vadd.xlane.f32.xlu1 %v420_v42  ;;  %v346_v46 = vmul.f32 %v1773_v19, %v337_v40 }
 0x41d   : > { %v475_v45 = vmul.f32 %v1860_v39, %v460_v32 }
 0x41e   : > { %v356_v51 = vmul.f32 %v1776_v21, %v346_v46 }
 0x41f   : > { %v485_v48 = vmul.f32 %v1864_v43, %v475_v45 }
 0x420   : > { %v360_v54 = vsub.f32 %v315_v17, %v356_v51 }
 0x421   : > { %v489_v50 = vsub.f32 %v445_v8, %v485_v48 }
 0x422   : > { %v369_v19 = vsel %vm361_vm8, %v360_v54, 0.0  ;;  %vm625_vm8 = vcmp.eq.s32.totalorder %v1745_v49, 7 }
 0x423   : > { %v494_v52 = vsel %vm493_vm1, %v489_v50, 0.0  ;;  %v379_v56 = vsel %vm334_vm15, %v369_v19, 0.0  ;;  %v1927_v19 = vsub.s32 5, %v1742_v47 }
 0x424   : > { %v496_v53 = vsel %vm495_vm2, %v494_v52, 0.0  ;;  %v502_v55 = vsel %vm122_vm0, %v494_v52, 0.0 }
 0x425   : > { %497 = vadd.xlane.f32.xlu1 %v496_v53 }
 0x429   : > { %503 = vadd.xlane.f32.xlu1 %v502_v55 }
 0x42d   : > { %380 = vadd.xlane.f32.xlu1 %v379_v56 }
 0x48f   : > { %v463_v57 = vpop.xlane.xlu1 %462 }
 0x490   : > { %v476_v21 = vmul.f32 %v1860_v39, %v463_v57 }
 0x492   : > { %v486_v58 = vmul.f32 %v1864_v43, %v476_v21 }
 0x494   : > { %v490_v59 = vsub.f32 %v446_v25, %v486_v58 }
 0x496   : > { %v499_v60 = vsel %vm493_vm1, %v490_v59, 0.0 }
 0x497   : > { %v505_v61 = vsel %vm122_vm0, %v499_v60, 0.0 }
 0x498   : > { %506 = vadd.xlane.f32.xlu1 %v505_v61 }
 0x4a9   : > { %v422_v62 = vpop.xlane.xlu1 %421 }
 0x4aa   : > { %v433_v0 = vmul.f32 %v1823_v2, %v422_v62 }
 0x4ac   : > { %v443_v1 = vmul.f32 %v1827_v5, %v433_v0 }
 0x4ae   : > { %v447_v3 = vsub.f32 %v403_v33, %v443_v1 }
 0x4b0   : > { %v456_v4 = vsel %vm449_vm12, %v447_v3, 0.0 }
 0x4b1   : > { %v464_v6 = vsel %vm122_vm0, %v456_v4, 0.0 }
 0x4b2   : > { %465 = vadd.xlane.f32.xlu1 %v464_v6  ;;  %v498_v7 = vpop.xlane.xlu1 %497 }
 0x4b3   : > { %1539 = vrcp.f32 %v498_v7  ;;  %v1403_v9 = vadd.f32 -1.0, %v498_v7 }
 0x4b5   : > { %v524_v17 = vsel %vm493_vm1, %v1403_v9, %v489_v50 }
 0x4b6   : > { %v504_v8 = vpop.xlane.xlu1 %503  ;;  %v1899_v22 = vrot.slane %v524_v17, %v1890_v14 }
 0x4ba   : > { %v381_v12 = vpop.xlane.xlu1 %380 }
 0x4bb   : > { %v390_v13 = vmul.f32 %v1798_v41, %v381_v12 }
 0x4bd   : > { %v1540_v15 = vpop.eup %1539  ;;  %v400_v18 = vmul.f32 %v1802_v44, %v390_v13 }
 0x4be   : > { %v1896_v11 = vrot.slane %v1540_v15, %v1890_v14 }
 0x4bf   : > { %v404_v20 = vsub.f32 %v360_v54, %v400_v18 }
 0x4c0   : > { %v519_v23 = vmul.f32 %v1896_v11, %v504_v8 }
 0x4c1   : > { %v413_v41 = vsel %vm405_vm10, %v404_v20, 0.0  ;;  %vm627_vm10 = vcmask 244743  }
 0x4c2   : > { %v529_v24 = vmul.f32 %v1899_v22, %v519_v23  ;;  %v423_v25 = vsel %vm334_vm15, %v413_v41, 0.0 }
 0x4c3   : > { %424 = vadd.xlane.f32.xlu1 %v423_v25 }
 0x4c4   : > { %v533_v44 = vsub.f32 %v489_v50, %v529_v24 }
 0x4c6   : > { %v538_v26 = vsel %vm537_vm3, %v533_v44, 0.0 }
 0x4c7   : > { %v540_v29 = vsel %vm539_vm4, %v538_v26, 0.0  ;;  %v546_v10 = vsel %vm122_vm0, %v538_v26, 0.0 }
 0x4c8   : > { %541 = vadd.xlane.f32.xlu0 %v540_v29 }
 0x4cc   : > { %547 = vadd.xlane.f32.xlu0 %v546_v10  ;;  %v1960_v10 = vsub.s32 6, %v1742_v47 }
 0x525   : > { %v507_v27 = vpop.xlane.xlu1 %506 }
 0x526   : > { %v520_v28 = vmul.f32 %v1896_v11, %v507_v27 }
 0x528   : > { %v530_v30 = vmul.f32 %v1899_v22, %v520_v28 }
 0x52a   : > { %v534_v31 = vsub.f32 %v490_v59, %v530_v30 }
 0x52c   : > { %v543_v32 = vsel %vm537_vm3, %v534_v31, 0.0 }
 0x52d   : > { %v549_v33 = vsel %vm122_vm0, %v543_v32, 0.0 }
 0x52e   : > { %550 = vadd.xlane.f32.xlu1 %v549_v33 }
 0x53f   : > { %v466_v35 = vpop.xlane.xlu1 %465 }
 0x540   : > { %v477_v36 = vmul.f32 %v1860_v39, %v466_v35 }
 0x542   : > { %v487_v38 = vmul.f32 %v1864_v43, %v477_v36 }
 0x544   : > { %v491_v40 = vsub.f32 %v447_v3, %v487_v38 }
 0x546   : > { %v500_v42 = vsel %vm493_vm1, %v491_v40, 0.0 }
 0x547   : > { %v508_v45 = vsel %vm122_vm0, %v500_v42, 0.0 }
 0x548   : > { %509 = vadd.xlane.f32.xlu0 %v508_v45 }
 0x550   : > { %v425_v46 = vpop.xlane.xlu1 %424 }
 0x551   : > { %v434_v48 = vmul.f32 %v1823_v2, %v425_v46 }
 0x553   : > { %v444_v50 = vmul.f32 %v1827_v5, %v434_v48 }
 0x555   : > { %v542_v51 = vpop.xlane.xlu0 %541  ;;  %v448_v52 = vsub.f32 %v404_v20, %v444_v50 }
 0x556   : > { %1541 = vrcp.f32 %v542_v51  ;;  %v1404_v55 = vadd.f32 -1.0, %v542_v51 }
 0x557   : > { %v457_v53 = vsel %vm449_vm12, %v448_v52, 0.0  ;;  %vm663_vm12 = vcmp.eq.s32.totalorder %v1745_v49, 8 }
 0x558   : > { %v467_v54 = vsel %vm334_vm15, %v457_v53, 0.0  ;;  %v568_v57 = vsel %vm537_vm3, %v1404_v55, %v533_v44 }
 0x559   : > { %468 = vadd.xlane.f32.xlu1 %v467_v54  ;;  %v548_v5 = vpop.xlane.xlu0 %547  ;;  %v1935_v21 = vrot.slane %v568_v57, %v1927_v19 }
 0x560   : > { %v1542_v56 = vpop.eup %1541 }
 0x561   : > { %v1932_v2 = vrot.slane %v1542_v56, %v1927_v19 }
 0x563   : > { %v563_v58 = vmul.f32 %v1932_v2, %v548_v5 }
 0x565   : > { %v573_v59 = vmul.f32 %v1935_v21, %v563_v58 }
 0x567   : > { %v577_v60 = vsub.f32 %v533_v44, %v573_v59 }
 0x569   : > { %v582_v61 = vsel %vm581_vm5, %v577_v60, 0.0 }
 0x56a   : > { %v584_v62 = vsel %vm583_vm6, %v582_v61, 0.0  ;;  %v590_v0 = vsel %vm122_vm0, %v582_v61, 0.0 }
 0x56b   : > { %585 = vadd.xlane.f32.xlu0 %v584_v62  ;;  %591 = vadd.xlane.f32.xlu1 %v590_v0 }
 0x5bb   : > { %v551_v1 = vpop.xlane.xlu1 %550 }
 0x5bc   : > { %v564_v3 = vmul.f32 %v1932_v2, %v551_v1  ;;  %v1992_v1 = vsub.s32 7, %v1742_v47 }
 0x5be   : > { %v574_v4 = vmul.f32 %v1935_v21, %v564_v3 }
 0x5c0   : > { %v578_v6 = vsub.f32 %v534_v31, %v574_v4 }
 0x5c2   : > { %v587_v7 = vsel %vm581_vm5, %v578_v6, 0.0 }
 0x5c3   : > { %v593_v8 = vsel %vm122_vm0, %v587_v7, 0.0 }
 0x5c4   : > { %594 = vadd.xlane.f32.xlu0 %v593_v8 }
 0x5d5   : > { %v510_v9 = vpop.xlane.xlu0 %509 }
 0x5d6   : > { %v521_v12 = vmul.f32 %v1896_v11, %v510_v9 }
 0x5d8   : > { %v531_v13 = vmul.f32 %v1899_v22, %v521_v12 }
 0x5da   : > { %v535_v15 = vsub.f32 %v491_v40, %v531_v13 }
 0x5dc   : > { %v544_v17 = vsel %vm537_vm3, %v535_v15, 0.0 }
 0x5dd   : > { %v552_v18 = vsel %vm122_vm0, %v544_v17, 0.0 }
 0x5de   : > { %553 = vadd.xlane.f32.xlu1 %v552_v18 }
 0x5e6   : > { %v469_v20 = vpop.xlane.xlu1 %468 }
 0x5e7   : > { %v478_v23 = vmul.f32 %v1860_v39, %v469_v20 }
 0x5e9   : > { %v488_v41 = vmul.f32 %v1864_v43, %v478_v23 }
 0x5eb   : > { %v492_v24 = vsub.f32 %v448_v52, %v488_v41 }
 0x5ed   : > { %v501_v25 = vsel %vm493_vm1, %v492_v24, 0.0  ;;  %vm735_vm1 = vcmp.eq.s32.totalorder %v1745_v49, 10 }
 0x5ee   : > { %v511_v44 = vsel %vm334_vm15, %v501_v25, 0.0 }
 0x5ef   : > { %512 = vadd.xlane.f32.xlu0 %v511_v44 }
 0x5f8   : > { %v586_v26 = vpop.xlane.xlu0 %585  ;;  %v592_v43 = vpop.xlane.xlu1 %591 }
 0x5f9   : > { %1543 = vrcp.f32 %v586_v26  ;;  %v1405_v29 = vadd.f32 -1.0, %v586_v26 }
 0x5fb   : > { %v612_v28 = vsel %vm581_vm5, %v1405_v29, %v577_v60 }
 0x5fc   : > { %v1968_v30 = vrot.slane %v612_v28, %v1960_v10 }
 0x603   : > { %v1544_v27 = vpop.eup %1543 }
 0x604   : > { %v1965_v39 = vrot.slane %v1544_v27, %v1960_v10 }
 0x606   : > { %v607_v31 = vmul.f32 %v1965_v39, %v592_v43 }
 0x608   : > { %v617_v32 = vmul.f32 %v1968_v30, %v607_v31 }
 0x60a   : > { %v621_v33 = vsub.f32 %v577_v60, %v617_v32 }
 0x60c   : > { %v626_v35 = vsel %vm625_vm8, %v621_v33, 0.0 }
 0x60d   : > { %v628_v36 = vsel %vm627_vm10, %v626_v35, 0.0 }
 0x60e   : > { %629 = vadd.xlane.f32.xlu1 %v628_v36 }
 0x651   : > { %v595_v38 = vpop.xlane.xlu0 %594 }
 0x652   : > { %v608_v40 = vmul.f32 %v1965_v39, %v595_v38 }
 0x654   : > { %v618_v42 = vmul.f32 %v1968_v30, %v608_v40 }
 0x656   : > { %v622_v45 = vsub.f32 %v578_v6, %v618_v42 }
 0x658   : > { %v631_v46 = vsel %vm625_vm8, %v622_v45, 0.0 }
 0x659   : > { %v634_v48 = vsel %vm122_vm0, %v631_v46, 0.0 }
 0x65a   : > { %635 = vadd.xlane.f32.xlu0 %v634_v48 }
 0x66b   : > { %v554_v50 = vpop.xlane.xlu1 %553 }
 0x66c   : > { %v565_v51 = vmul.f32 %v1932_v2, %v554_v50 }
 0x66e   : > { %v575_v52 = vmul.f32 %v1935_v21, %v565_v51 }
 0x670   : > { %v579_v53 = vsub.f32 %v535_v15, %v575_v52 }
 0x672   : > { %v588_v54 = vsel %vm581_vm5, %v579_v53, 0.0 }
 0x673   : > { %v596_v55 = vsel %vm122_vm0, %v588_v54, 0.0 }
 0x674   : > { %597 = vadd.xlane.f32.xlu1 %v596_v55 }
 0x67c   : > { %v513_v56 = vpop.xlane.xlu0 %512 }
 0x67d   : > { %v522_v57 = vmul.f32 %v1896_v11, %v513_v56 }
 0x67f   : > { %v532_v5 = vmul.f32 %v1899_v22, %v522_v57 }
 0x681   : > { %v536_v58 = vsub.f32 %v492_v24, %v532_v5 }
 0x683   : > { %v545_v59 = vsel %vm537_vm3, %v536_v58, 0.0  ;;  %vm771_vm3 = vcmp.eq.s32.totalorder %v1745_v49, 11 }
 0x684   : > { %v555_v60 = vsel %vm334_vm15, %v545_v59, 0.0 }
 0x685   : > { %556 = vadd.xlane.f32.xlu0 %v555_v60 }
 0x69b   : > { %v630_v61 = vpop.xlane.xlu1 %629 }
 0x69c   : > { %1545 = vrcp.f32 %v630_v61  ;;  %v1406_v62 = vadd.f32 -1.0, %v630_v61 }
 0x69e   : > { %v652_v3 = vsel %vm625_vm8, %v1406_v62, %v621_v33 }
 0x69f   : > { %v2001_v6 = vrot.slane %v652_v3, %v1992_v1 }
 0x6a6   : > { %v1546_v0 = vpop.eup %1545 }
 0x6a7   : > { %v1997_v11 = vrot.slane %v1546_v0, %v1992_v1 }
 0x6e7   : > { %v636_v22 = vpop.xlane.xlu0 %635 }
 0x6e8   : > { %v648_v4 = vmul.f32 %v1997_v11, %v636_v22 }
 0x6ea   : > { %v657_v7 = vmul.f32 %v2001_v6, %v648_v4 }
 0x6ec   : > { %v660_v8 = vsub.f32 %v622_v45, %v657_v7 }
 0x6ee   : > { %v664_v47 = vsel %vm663_vm12, %v660_v8, 0.0 }
 0x6ef   : > { %v670_v9 = vsel %vm122_vm0, %v664_v47, 0.0  ;;  %v665_v12 = vsel %vm318_vm7, %v664_v47, 0.0 }
 0x6f0   : > { %671 = vadd.xlane.f32.xlu0 %v670_v9  ;;  %666 = vadd.xlane.f32.xlu1 %v665_v12 }
 0x701   : > { %v598_v13 = vpop.xlane.xlu1 %597 }
 0x702   : > { %v609_v15 = vmul.f32 %v1965_v39, %v598_v13 }
 0x704   : > { %v619_v17 = vmul.f32 %v1968_v30, %v609_v15 }
 0x706   : > { %v623_v18 = vsub.f32 %v579_v53, %v619_v17 }
 0x708   : > { %v632_v20 = vsel %vm625_vm8, %v623_v18, 0.0 }
 0x709   : > { %v637_v23 = vsel %vm122_vm0, %v632_v20, 0.0 }
 0x70a   : > { %638 = vadd.xlane.f32.xlu1 %v637_v23 }
 0x712   : > { %v557_v41 = vpop.xlane.xlu0 %556 }
 0x713   : > { %v566_v24 = vmul.f32 %v1932_v2, %v557_v41 }
 0x715   : > { %v576_v25 = vmul.f32 %v1935_v21, %v566_v24 }
 0x717   : > { %v580_v44 = vsub.f32 %v536_v58, %v576_v25 }
 0x719   : > { %v589_v26 = vsel %vm581_vm5, %v580_v44, 0.0  ;;  %vm807_vm5 = vcmp.eq.s32.totalorder %v1745_v49, 12 }
 0x71a   : > { %v599_v29 = vsel %vm334_vm15, %v589_v26, 0.0 }
 0x71b   : > { %600 = vadd.xlane.f32.xlu0 %v599_v29 }
 0x77d   : > { %v667_v27 = vpop.xlane.xlu1 %666  ;;  %v672_v2 = vpop.xlane.xlu0 %671 }
 0x77e   : > { %1547 = vrcp.f32 %v667_v27  ;;  %v1407_v28 = vadd.f32 -1.0, %v667_v27 }
 0x780   : > { %v688_v31 = vsel %vm663_vm12, %v1407_v28, %v660_v8 }
 0x781   : > { %v2025_v21 = vrot.slane %v688_v31, %v1768_v16 }
 0x788   : > { %v1548_v43 = vpop.eup %1547 }
 0x789   : > { %v2022_v32 = vrot.slane %v1548_v43, %v1768_v16 }
 0x78b   : > { %v684_v33 = vmul.f32 %v2022_v32, %v672_v2 }
 0x78d   : > { %v693_v35 = vmul.f32 %v2025_v21, %v684_v33 }
 0x78f   : > { %v696_v36 = vsub.f32 %v660_v8, %v693_v35 }
 0x791   : > { %v700_v38 = vsel %vm699_vm14, %v696_v36, 0.0 }
 0x792   : > { %v701_v40 = vsel %vm363_vm9, %v700_v38, 0.0  ;;  %v706_v42 = vsel %vm122_vm0, %v700_v38, 0.0 }
 0x793   : > { %702 = vadd.xlane.f32.xlu1 %v701_v40 }
 0x797   : > { %707 = vadd.xlane.f32.xlu1 %v706_v42  ;;  %v639_v45 = vpop.xlane.xlu1 %638 }
 0x798   : > { %v649_v46 = vmul.f32 %v1997_v11, %v639_v45 }
 0x79a   : > { %v658_v48 = vmul.f32 %v2001_v6, %v649_v46 }
 0x79c   : > { %v661_v50 = vsub.f32 %v623_v18, %v658_v48 }
 0x79e   : > { %v668_v51 = vsel %vm663_vm12, %v661_v50, 0.0 }
 0x79f   : > { %v673_v52 = vsel %vm122_vm0, %v668_v51, 0.0 }
 0x7a0   : > { %674 = vadd.xlane.f32.xlu0 %v673_v52 }
 0x7a8   : > { %v601_v53 = vpop.xlane.xlu0 %600 }
 0x7a9   : > { %v610_v54 = vmul.f32 %v1965_v39, %v601_v53 }
 0x7ab   : > { %v620_v55 = vmul.f32 %v1968_v30, %v610_v54 }
 0x7ad   : > { %v624_v56 = vsub.f32 %v580_v44, %v620_v55 }
 0x7af   : > { %v633_v57 = vsel %vm625_vm8, %v624_v56, 0.0  ;;  %vm843_vm8 = vcmp.eq.s32.totalorder %v1745_v49, 13 }
 0x7b0   : > { %v640_v5 = vsel %vm334_vm15, %v633_v57, 0.0 }
 0x7b1   : > { %641 = vadd.xlane.f32.xlu0 %v640_v5 }
 0x820   : > { %v703_v58 = vpop.xlane.xlu1 %702 }
 0x821   : > { %1549 = vrcp.f32 %v703_v58  ;;  %v1408_v59 = vadd.f32 -1.0, %v703_v58 }
 0x823   : > { %v724_v61 = vsel %vm699_vm14, %v1408_v59, %v696_v36 }
 0x824   : > { %v708_v39 = vpop.xlane.xlu1 %707  ;;  %v2050_v30 = vrot.slane %v724_v61, %v1791_v37 }
 0x82b   : > { %v1550_v60 = vpop.eup %1549 }
 0x82c   : > { %v2047_v62 = vrot.slane %v1550_v60, %v1791_v37 }
 0x82d   : > { %v675_v0 = vpop.xlane.xlu0 %674 }
 0x82e   : > { %v720_v3 = vmul.f32 %v2047_v62, %v708_v39  ;;  %v685_v22 = vmul.f32 %v2022_v32, %v675_v0 }
 0x830   : > { %v729_v4 = vmul.f32 %v2050_v30, %v720_v3  ;;  %v694_v7 = vmul.f32 %v2025_v21, %v685_v22 }
 0x832   : > { %v732_v8 = vsub.f32 %v696_v36, %v729_v4  ;;  %v697_v47 = vsub.f32 %v661_v50, %v694_v7 }
 0x834   : > { %v704_v9 = vsel %vm699_vm14, %v697_v47, 0.0  ;;  %v736_v12 = vsel %vm735_vm1, %v732_v8, 0.0 }
 0x835   : > { %v709_v13 = vsel %vm122_vm0, %v704_v9, 0.0  ;;  %v737_v15 = vsel %vm407_vm11, %v736_v12, 0.0  ;;  %v742_v17 = vsel %vm122_vm0, %v736_v12, 0.0 }
 0x836   : > { %710 = vadd.xlane.f32.xlu1 %v709_v13  ;;  %738 = vadd.xlane.f32.xlu0 %v737_v15 }
 0x83a   : > { %743 = vadd.xlane.f32.xlu1 %v742_v17 }
 0x83e   : > { %v642_v18 = vpop.xlane.xlu0 %641 }
 0x83f   : > { %v650_v20 = vmul.f32 %v1997_v11, %v642_v18 }
 0x841   : > { %v659_v23 = vmul.f32 %v2001_v6, %v650_v20 }
 0x843   : > { %v662_v41 = vsub.f32 %v624_v56, %v659_v23 }
 0x845   : > { %v669_v24 = vsel %vm663_vm12, %v662_v41, 0.0  ;;  %vm879_vm12 = vcmp.eq.s32.totalorder %v1745_v49, 14 }
 0x846   : > { %v676_v25 = vsel %vm334_vm15, %v669_v24, 0.0 }
 0x847   : > { %677 = vadd.xlane.f32.xlu0 %v676_v25 }
 0x8c3   : > { %v739_v44 = vpop.xlane.xlu0 %738  ;;  %v711_v26 = vpop.xlane.xlu1 %710 }
 0x8c4   : > { %1551 = vrcp.f32 %v739_v44  ;;  %v721_v29 = vmul.f32 %v2047_v62, %v711_v26  ;;  %v1409_v43 = vadd.f32 -1.0, %v739_v44 }
 0x8c6   : > { %v730_v27 = vmul.f32 %v2050_v30, %v721_v29  ;;  %v760_v2 = vsel %vm735_vm1, %v1409_v43, %v732_v8 }
 0x8c7   : > { %v744_v35 = vpop.xlane.xlu1 %743  ;;  %v764_v36 = vrot.slane %v760_v2, %v1818_v63 }
 0x8c8   : > { %v733_v28 = vsub.f32 %v697_v47, %v730_v27 }
 0x8ca   : > { %v740_v11 = vsel %vm735_vm1, %v733_v28, 0.0 }
 0x8cb   : > { %v745_v6 = vsel %vm122_vm0, %v740_v11, 0.0 }
 0x8cc   : > { %746 = vadd.xlane.f32.xlu1 %v745_v6 }
 0x8ce   : > { %v1552_v31 = vpop.eup %1551 }
 0x8cf   : > { %v755_v33 = vrot.slane %v1552_v31, %v1818_v63 }
 0x8d1   : > { %v756_v38 = vmul.f32 %v755_v33, %v744_v35 }
 0x8d3   : > { %v765_v40 = vmul.f32 %v764_v36, %v756_v38 }
 0x8d4   : > { %v678_v42 = vpop.xlane.xlu0 %677 }
 0x8d5   : > { %v768_v45 = vsub.f32 %v732_v8, %v765_v40  ;;  %v686_v46 = vmul.f32 %v2022_v32, %v678_v42 }
 0x8d7   : > { %v695_v48 = vmul.f32 %v2025_v21, %v686_v46  ;;  %v772_v50 = vsel %vm771_vm3, %v768_v45, 0.0 }
 0x8d8   : > { %v773_v51 = vsel %vm451_vm13, %v772_v50, 0.0  ;;  %v778_v55 = vsel %vm122_vm0, %v772_v50, 0.0 }
 0x8d9   : > { %774 = vadd.xlane.f32.xlu0 %v773_v51  ;;  %v698_v52 = vsub.f32 %v662_v41, %v695_v48 }
 0x8db   : > { %v705_v53 = vsel %vm699_vm14, %v698_v52, 0.0  ;;  %vm915_vm14 = vcmp.eq.s32.totalorder %v1745_v49, 15 }
 0x8dc   : > { %v712_v54 = vsel %vm334_vm15, %v705_v53, 0.0 }
 0x8dd   : > { %713 = vadd.xlane.f32.xlu1 %v712_v54  ;;  %779 = vadd.xlane.f32.xlu0 %v778_v55 }
 0x959   : > { %v747_v56 = vpop.xlane.xlu1 %746 }
 0x95a   : > { %v757_v32 = vmul.f32 %v755_v33, %v747_v56 }
 0x95c   : > { %v766_v57 = vmul.f32 %v764_v36, %v757_v32 }
 0x95e   : > { %v769_v21 = vsub.f32 %v733_v28, %v766_v57 }
 0x960   : > { %v776_v5 = vsel %vm771_vm3, %v769_v21, 0.0 }
 0x961   : > { %v781_v58 = vsel %vm122_vm0, %v776_v5, 0.0 }
 0x962   : > { %782 = vadd.xlane.f32.xlu1 %v781_v58 }
 0x966   : > { %v775_v59 = vpop.xlane.xlu0 %774 }
 0x967   : > { %1553 = vrcp.f32 %v775_v59  ;;  %v1410_v39 = vadd.f32 -1.0, %v775_v59 }
 0x969   : > { %v796_v4 = vsel %vm771_vm3, %v1410_v39, %v768_v45 }
 0x96a   : > { %v714_v60 = vpop.xlane.xlu1 %713  ;;  %v780_v9 = vpop.xlane.xlu0 %779  ;;  %v800_v12 = vrot.slane %v796_v4, %v1853_v34 }
 0x96b   : > { %v722_v61 = vmul.f32 %v2047_v62, %v714_v60 }
 0x96d   : > { %v731_v0 = vmul.f32 %v2050_v30, %v722_v61 }
 0x96f   : > { %v734_v3 = vsub.f32 %v698_v52, %v731_v0 }
 0x971   : > { %v1554_v22 = vpop.eup %1553  ;;  %v741_v7 = vsel %vm735_vm1, %v734_v3, 0.0  ;;  %vm945_vm1 = vcmp.eq.s32.totalorder %v1745_v49, 16 }
 0x972   : > { %v791_v8 = vrot.slane %v1554_v22, %v1853_v34  ;;  %v748_v47 = vsel %vm334_vm15, %v741_v7, 0.0 }
 0x973   : > { %749 = vadd.xlane.f32.xlu0 %v748_v47 }
 0x974   : > { %v792_v62 = vmul.f32 %v791_v8, %v780_v9 }
 0x976   : > { %v801_v13 = vmul.f32 %v800_v12, %v792_v62 }
 0x978   : > { %v804_v30 = vsub.f32 %v768_v45, %v801_v13 }
 0x97a   : > { %v808_v15 = vsel %vm807_vm5, %v804_v30, 0.0 }
 0x97b   : > { %v809_v17 = vsel %vm495_vm2, %v808_v15, 0.0  ;;  %v814_v18 = vsel %vm122_vm0, %v808_v15, 0.0 }
 0x97c   : > { %810 = vadd.xlane.f32.xlu1 %v809_v17  ;;  %815 = vadd.xlane.f32.xlu0 %v814_v18 }
 0x9ef   : > { %v783_v20 = vpop.xlane.xlu1 %782 }
 0x9f0   : > { %v793_v23 = vmul.f32 %v791_v8, %v783_v20 }
 0x9f2   : > { %v802_v41 = vmul.f32 %v800_v12, %v793_v23 }
 0x9f4   : > { %v805_v24 = vsub.f32 %v769_v21, %v802_v41 }
 0x9f6   : > { %v812_v25 = vsel %vm807_vm5, %v805_v24, 0.0 }
 0x9f7   : > { %v817_v44 = vsel %vm122_vm0, %v812_v25, 0.0 }
 0x9f8   : > { %818 = vadd.xlane.f32.xlu1 %v817_v44 }
 0xa00   : > { %v750_v26 = vpop.xlane.xlu0 %749 }
 0xa01   : > { %v758_v29 = vmul.f32 %v755_v33, %v750_v26 }
 0xa03   : > { %v767_v27 = vmul.f32 %v764_v36, %v758_v29 }
 0xa05   : > { %v770_v28 = vsub.f32 %v734_v3, %v767_v27 }
 0xa07   : > { %v777_v43 = vsel %vm771_vm3, %v770_v28, 0.0  ;;  %vm974_vm3 = vcmp.eq.s32.totalorder %v1745_v49, 17 }
 0xa08   : > { %v784_v11 = vsel %vm334_vm15, %v777_v43, 0.0 }
 0xa09   : > { %785 = vadd.xlane.f32.xlu0 %v784_v11  ;;  %v811_v6 = vpop.xlane.xlu1 %810  ;;  %v816_v40 = vpop.xlane.xlu0 %815 }
 0xa0a   : > { %1555 = vrcp.f32 %v811_v6  ;;  %v1411_v31 = vadd.f32 -1.0, %v811_v6 }
 0xa0c   : > { %v832_v35 = vsel %vm807_vm5, %v1411_v31, %v804_v30 }
 0xa0d   : > { %v836_v33 = vrot.slane %v832_v35, %v1890_v14 }
 0xa14   : > { %v1556_v2 = vpop.eup %1555 }
 0xa15   : > { %v827_v38 = vrot.slane %v1556_v2, %v1890_v14 }
 0xa17   : > { %v828_v36 = vmul.f32 %v827_v38, %v816_v40 }
 0xa19   : > { %v837_v42 = vmul.f32 %v836_v33, %v828_v36 }
 0xa1b   : > { %v840_v45 = vsub.f32 %v804_v30, %v837_v42 }
 0xa1d   : > { %v844_v46 = vsel %vm843_vm8, %v840_v45, 0.0 }
 0xa1e   : > { %v850_v48 = vsel %vm122_vm0, %v844_v46, 0.0  ;;  %v845_v50 = vsel %vm539_vm4, %v844_v46, 0.0 }
 0xa1f   : > { %851 = vadd.xlane.f32.xlu0 %v850_v48  ;;  %846 = vadd.xlane.f32.xlu1 %v845_v50 }
 0xa85   : > { %v819_v51 = vpop.xlane.xlu1 %818 }
 0xa86   : > { %v829_v52 = vmul.f32 %v827_v38, %v819_v51 }
 0xa88   : > { %v838_v53 = vmul.f32 %v836_v33, %v829_v52 }
 0xa8a   : > { %v841_v54 = vsub.f32 %v805_v24, %v838_v53 }
 0xa8c   : > { %v848_v55 = vsel %vm843_vm8, %v841_v54, 0.0 }
 0xa8d   : > { %v853_v56 = vsel %vm122_vm0, %v848_v55, 0.0 }
 0xa8e   : > { %854 = vadd.xlane.f32.xlu1 %v853_v56 }
 0xa96   : > { %v786_v32 = vpop.xlane.xlu0 %785 }
 0xa97   : > { %v794_v57 = vmul.f32 %v791_v8, %v786_v32 }
 0xa99   : > { %v803_v21 = vmul.f32 %v800_v12, %v794_v57 }
 0xa9b   : > { %v806_v5 = vsub.f32 %v770_v28, %v803_v21 }
 0xa9d   : > { %v813_v58 = vsel %vm807_vm5, %v806_v5, 0.0  ;;  %vm1003_vm5 = vcmp.eq.s32.totalorder %v1745_v49, 18 }
 0xa9e   : > { %v820_v59 = vsel %vm334_vm15, %v813_v58, 0.0 }
 0xa9f   : > { %821 = vadd.xlane.f32.xlu0 %v820_v59 }
 0xaac   : > { %v847_v60 = vpop.xlane.xlu1 %846  ;;  %v852_v22 = vpop.xlane.xlu0 %851 }
 0xaad   : > { %1557 = vrcp.f32 %v847_v60  ;;  %v1412_v61 = vadd.f32 -1.0, %v847_v60 }
 0xaaf   : > { %v868_v0 = vsel %vm843_vm8, %v1412_v61, %v840_v45 }
 0xab0   : > { %v872_v4 = vrot.slane %v868_v0, %v1927_v19 }
 0xab7   : > { %v1558_v39 = vpop.eup %1557 }
 0xab8   : > { %v863_v3 = vrot.slane %v1558_v39, %v1927_v19 }
 0xaba   : > { %v864_v7 = vmul.f32 %v863_v3, %v852_v22 }
 0xabc   : > { %v873_v8 = vmul.f32 %v872_v4, %v864_v7 }
 0xabe   : > { %v876_v47 = vsub.f32 %v840_v45, %v873_v8 }
 0xac0   : > { %v880_v9 = vsel %vm879_vm12, %v876_v47, 0.0 }
 0xac1   : > { %v886_v12 = vsel %vm122_vm0, %v880_v9, 0.0  ;;  %v881_v62 = vsel %vm583_vm6, %v880_v9, 0.0 }
 0xac2   : > { %887 = vadd.xlane.f32.xlu0 %v886_v12  ;;  %882 = vadd.xlane.f32.xlu1 %v881_v62 }
 0xb1b   : > { %v855_v13 = vpop.xlane.xlu1 %854 }
 0xb1c   : > { %v865_v30 = vmul.f32 %v863_v3, %v855_v13 }
 0xb1e   : > { %v874_v15 = vmul.f32 %v872_v4, %v865_v30 }
 0xb20   : > { %v877_v17 = vsub.f32 %v841_v54, %v874_v15 }
 0xb22   : > { %v884_v18 = vsel %vm879_vm12, %v877_v17, 0.0 }
 0xb23   : > { %v889_v20 = vsel %vm122_vm0, %v884_v18, 0.0 }
 0xb24   : > { %890 = vadd.xlane.f32.xlu1 %v889_v20 }
 0xb2c   : > { %v822_v23 = vpop.xlane.xlu0 %821 }
 0xb2d   : > { %v830_v41 = vmul.f32 %v827_v38, %v822_v23 }
 0xb2f   : > { %v839_v24 = vmul.f32 %v836_v33, %v830_v41 }
 0xb31   : > { %v842_v25 = vsub.f32 %v806_v5, %v839_v24 }
 0xb33   : > { %v849_v44 = vsel %vm843_vm8, %v842_v25, 0.0  ;;  %vm1032_vm8 = vcmp.eq.s32.totalorder %v1745_v49, 19 }
 0xb34   : > { %v856_v26 = vsel %vm334_vm15, %v849_v44, 0.0 }
 0xb35   : > { %857 = vadd.xlane.f32.xlu0 %v856_v26 }
 0xb4f   : > { %v883_v29 = vpop.xlane.xlu1 %882  ;;  %v888_v6 = vpop.xlane.xlu0 %887 }
 0xb50   : > { %1559 = vrcp.f32 %v883_v29  ;;  %v1413_v27 = vadd.f32 -1.0, %v883_v29 }
 0xb52   : > { %v904_v43 = vsel %vm879_vm12, %v1413_v27, %v876_v47 }
 0xb53   : > { %v908_v31 = vrot.slane %v904_v43, %v1960_v10 }
 0xb5a   : > { %v1560_v28 = vpop.eup %1559 }
 0xb5b   : > { %v899_v11 = vrot.slane %v1560_v28, %v1960_v10 }
 0xb5d   : > { %v900_v2 = vmul.f32 %v899_v11, %v888_v6 }
 0xb5f   : > { %v909_v35 = vmul.f32 %v908_v31, %v900_v2 }
 0xb61   : > { %v912_v38 = vsub.f32 %v876_v47, %v909_v35 }
 0xb63   : > { %v916_v40 = vsel %vm915_vm14, %v912_v38, 0.0 }
 0xb64   : > { %v917_v33 = vsel %vm627_vm10, %v916_v40, 0.0 }
 0xb65   : > { %918 = vadd.xlane.f32.xlu1 %v917_v33 }
 0xbb1   : > { %v891_v36 = vpop.xlane.xlu1 %890 }
 0xbb2   : > { %v901_v42 = vmul.f32 %v899_v11, %v891_v36 }
 0xbb4   : > { %v910_v45 = vmul.f32 %v908_v31, %v901_v42 }
 0xbb6   : > { %v913_v46 = vsub.f32 %v877_v17, %v910_v45 }
 0xbb8   : > { %v920_v48 = vsel %vm915_vm14, %v913_v46, 0.0 }
 0xbb9   : > { %v922_v50 = vsel %vm122_vm0, %v920_v48, 0.0 }
 0xbba   : > { %923 = vadd.xlane.f32.xlu0 %v922_v50 }
 0xbc2   : > { %v858_v51 = vpop.xlane.xlu0 %857 }
 0xbc3   : > { %v866_v52 = vmul.f32 %v863_v3, %v858_v51 }
 0xbc5   : > { %v875_v53 = vmul.f32 %v872_v4, %v866_v52 }
 0xbc7   : > { %v878_v54 = vsub.f32 %v842_v25, %v875_v53 }
 0xbc9   : > { %v885_v55 = vsel %vm879_vm12, %v878_v54, 0.0  ;;  %vm1061_vm12 = vcmp.eq.s32.totalorder %v1745_v49, 20 }
 0xbca   : > { %v892_v56 = vsel %vm334_vm15, %v885_v55, 0.0 }
 0xbcb   : > { %893 = vadd.xlane.f32.xlu1 %v892_v56 }
 0xbf2   : > { %v919_v32 = vpop.xlane.xlu1 %918 }
 0xbf3   : > { %1561 = vrcp.f32 %v919_v32  ;;  %v1414_v57 = vadd.f32 -1.0, %v919_v32 }
 0xbf5   : > { %v936_v5 = vsel %vm915_vm14, %v1414_v57, %v912_v38 }
 0xbf6   : > { %v940_v61 = vrot.slane %v936_v5, %v1992_v1 }
 0xbfd   : > { %v1562_v21 = vpop.eup %1561 }
 0xbfe   : > { %v932_v58 = vrot.slane %v1562_v21, %v1992_v1 }
 0xc47   : > { %v924_v59 = vpop.xlane.xlu0 %923 }
 0xc48   : > { %v933_v60 = vmul.f32 %v932_v58, %v924_v59 }
 0xc4a   : > { %v941_v39 = vmul.f32 %v940_v61, %v933_v60 }
 0xc4c   : > { %v943_v0 = vsub.f32 %v913_v46, %v941_v39 }
 0xc4e   : > { %v946_v3 = vsel %vm945_vm1, %v943_v0, 0.0 }
 0xc4f   : > { %v951_v22 = vsel %vm122_vm0, %v946_v3, 0.0  ;;  %v947_v4 = vsel %vm318_vm7, %v946_v3, 0.0 }
 0xc50   : > { %952 = vadd.xlane.f32.xlu1 %v951_v22  ;;  %948 = vadd.xlane.f32.xlu0 %v947_v4 }
 0xc58   : > { %v894_v7 = vpop.xlane.xlu1 %893 }
 0xc59   : > { %v902_v8 = vmul.f32 %v899_v11, %v894_v7 }
 0xc5b   : > { %v911_v47 = vmul.f32 %v908_v31, %v902_v8 }
 0xc5d   : > { %v914_v9 = vsub.f32 %v878_v54, %v911_v47 }
 0xc5f   : > { %v921_v12 = vsel %vm915_vm14, %v914_v9, 0.0  ;;  %vm1090_vm14 = vcmp.eq.s32.totalorder %v1745_v49, 21 }
 0xc60   : > { %v925_v62 = vsel %vm334_vm15, %v921_v12, 0.0 }
 0xc61   : > { %926 = vadd.xlane.f32.xlu0 %v925_v62 }
 0xcdd   : > { %v949_v13 = vpop.xlane.xlu0 %948  ;;  %v953_v20 = vpop.xlane.xlu1 %952 }
 0xcde   : > { %1563 = vrcp.f32 %v949_v13  ;;  %v1415_v30 = vadd.f32 -1.0, %v949_v13 }
 0xce0   : > { %v965_v17 = vsel %vm945_vm1, %v1415_v30, %v943_v0 }
 0xce1   : > { %v969_v23 = vrot.slane %v965_v17, %v1768_v16 }
 0xce8   : > { %v1564_v15 = vpop.eup %1563 }
 0xce9   : > { %v961_v18 = vrot.slane %v1564_v15, %v1768_v16 }
 0xceb   : > { %v962_v41 = vmul.f32 %v961_v18, %v953_v20 }
 0xced   : > { %v970_v24 = vmul.f32 %v969_v23, %v962_v41 }
 0xcee   : > { %v927_v25 = vpop.xlane.xlu0 %926 }
 0xcef   : > { %v972_v44 = vsub.f32 %v943_v0, %v970_v24  ;;  %v934_v26 = vmul.f32 %v932_v58, %v927_v25 }
 0xcf1   : > { %v942_v29 = vmul.f32 %v940_v61, %v934_v26  ;;  %v975_v27 = vsel %vm974_vm3, %v972_v44, 0.0 }
 0xcf2   : > { %v976_v28 = vsel %vm363_vm9, %v975_v27, 0.0  ;;  %v980_v31 = vsel %vm122_vm0, %v975_v27, 0.0 }
 0xcf3   : > { %977 = vadd.xlane.f32.xlu1 %v976_v28  ;;  %v944_v43 = vsub.f32 %v914_v9, %v942_v29 }
 0xcf5   : > { %v950_v11 = vsel %vm945_vm1, %v944_v43, 0.0  ;;  %vm1119_vm1 = vcmp.eq.s32.totalorder %v1745_v49, 22 }
 0xcf6   : > { %v954_v6 = vsel %vm334_vm15, %v950_v11, 0.0 }
 0xcf7   : > { %955 = vadd.xlane.f32.xlu0 %v954_v6  ;;  %981 = vadd.xlane.f32.xlu1 %v980_v31 }
 0xd80   : > { %v978_v2 = vpop.xlane.xlu1 %977 }
 0xd81   : > { %1565 = vrcp.f32 %v978_v2  ;;  %v1416_v40 = vadd.f32 -1.0, %v978_v2 }
 0xd83   : > { %v994_v45 = vsel %vm974_vm3, %v1416_v40, %v972_v44 }
 0xd84   : > { %v956_v35 = vpop.xlane.xlu0 %955  ;;  %v982_v51 = vpop.xlane.xlu1 %981  ;;  %v998_v52 = vrot.slane %v994_v45, %v1791_v37 }
 0xd85   : > { %v963_v38 = vmul.f32 %v961_v18, %v956_v35 }
 0xd87   : > { %v971_v33 = vmul.f32 %v969_v23, %v963_v38 }
 0xd89   : > { %v973_v36 = vsub.f32 %v944_v43, %v971_v33 }
 0xd8b   : > { %v1566_v42 = vpop.eup %1565  ;;  %v979_v46 = vsel %vm974_vm3, %v973_v36, 0.0  ;;  %vm1148_vm3 = vcmp.eq.s32.totalorder %v1745_v49, 23 }
 0xd8c   : > { %v990_v48 = vrot.slane %v1566_v42, %v1791_v37  ;;  %v983_v50 = vsel %vm334_vm15, %v979_v46, 0.0 }
 0xd8d   : > { %984 = vadd.xlane.f32.xlu0 %v983_v50 }
 0xd8e   : > { %v991_v53 = vmul.f32 %v990_v48, %v982_v51 }
 0xd90   : > { %v999_v54 = vmul.f32 %v998_v52, %v991_v53 }
 0xd92   : > { %v1001_v55 = vsub.f32 %v972_v44, %v999_v54 }
 0xd94   : > { %v1004_v56 = vsel %vm1003_vm5, %v1001_v55, 0.0 }
 0xd95   : > { %v1009_v32 = vsel %vm122_vm0, %v1004_v56, 0.0  ;;  %v1005_v57 = vsel %vm407_vm11, %v1004_v56, 0.0 }
 0xd96   : > { %1010 = vadd.xlane.f32.xlu0 %v1009_v32  ;;  %1006 = vadd.xlane.f32.xlu1 %v1005_v57 }
 0xe1a   : > { %v985_v21 = vpop.xlane.xlu0 %984 }
 0xe1b   : > { %v992_v5 = vmul.f32 %v990_v48, %v985_v21 }
 0xe1d   : > { %v1000_v58 = vmul.f32 %v998_v52, %v992_v5 }
 0xe1f   : > { %v1002_v59 = vsub.f32 %v973_v36, %v1000_v58 }
 0xe21   : > { %v1008_v60 = vsel %vm1003_vm5, %v1002_v59, 0.0 }
 0xe22   : > { %v1012_v61 = vsel %vm334_vm15, %v1008_v60, 0.0 }
 0xe23   : > { %1013 = vadd.xlane.f32.xlu1 %v1012_v61  ;;  %v1007_v39 = vpop.xlane.xlu1 %1006  ;;  %v1011_v7 = vpop.xlane.xlu0 %1010 }
 0xe24   : > { %1567 = vrcp.f32 %v1007_v39  ;;  %v1417_v0 = vadd.f32 -1.0, %v1007_v39 }
 0xe26   : > { %v1023_v22 = vsel %vm1003_vm5, %v1417_v0, %v1001_v55  ;;  %vm1193_vm5 = vcmp.eq.s32.totalorder %v1745_v49, 25 }
 0xe27   : > { %v1027_v8 = vrot.slane %v1023_v22, %v1818_v63 }
 0xe2e   : > { %v1568_v3 = vpop.eup %1567 }
 0xe2f   : > { %v1019_v4 = vrot.slane %v1568_v3, %v1818_v63 }
 0xe31   : > { %v1020_v47 = vmul.f32 %v1019_v4, %v1011_v7 }
 0xe33   : > { %v1028_v9 = vmul.f32 %v1027_v8, %v1020_v47 }
 0xe35   : > { %v1030_v12 = vsub.f32 %v1001_v55, %v1028_v9 }
 0xe37   : > { %v1033_v62 = vsel %vm1032_vm8, %v1030_v12, 0.0 }
 0xe38   : > { %v1038_v13 = vsel %vm122_vm0, %v1033_v62, 0.0  ;;  %v1034_v30 = vsel %vm451_vm13, %v1033_v62, 0.0 }
 0xe39   : > { %1039 = vadd.xlane.f32.xlu1 %v1038_v13  ;;  %1035 = vadd.xlane.f32.xlu0 %v1034_v30 }
 0xeb0   : > { %v1014_v15 = vpop.xlane.xlu1 %1013 }
 0xeb1   : > { %v1021_v17 = vmul.f32 %v1019_v4, %v1014_v15 }
 0xeb3   : > { %v1029_v18 = vmul.f32 %v1027_v8, %v1021_v17 }
 0xeb5   : > { %v1031_v20 = vsub.f32 %v1002_v59, %v1029_v18 }
 0xeb7   : > { %v1037_v23 = vsel %vm1032_vm8, %v1031_v20, 0.0 }
 0xeb8   : > { %v1041_v41 = vsel %vm334_vm15, %v1037_v23, 0.0 }
 0xeb9   : > { %1042 = vadd.xlane.f32.xlu0 %v1041_v41 }
 0xec6   : > { %v1036_v24 = vpop.xlane.xlu0 %1035  ;;  %v1040_v27 = vpop.xlane.xlu1 %1039 }
 0xec7   : > { %1569 = vrcp.f32 %v1036_v24  ;;  %v1418_v25 = vadd.f32 -1.0, %v1036_v24 }
 0xec9   : > { %v1052_v26 = vsel %vm1032_vm8, %v1418_v25, %v1030_v12 }
 0xeca   : > { %v1056_v28 = vrot.slane %v1052_v26, %v1853_v34 }
 0xed1   : > { %v1570_v44 = vpop.eup %1569 }
 0xed2   : > { %v1048_v29 = vrot.slane %v1570_v44, %v1853_v34 }
 0xed4   : > { %v1049_v43 = vmul.f32 %v1048_v29, %v1040_v27 }
 0xed6   : > { %v1057_v11 = vmul.f32 %v1056_v28, %v1049_v43 }
 0xed8   : > { %v1059_v6 = vsub.f32 %v1030_v12, %v1057_v11 }
 0xeda   : > { %v1062_v31 = vsel %vm1061_vm12, %v1059_v6, 0.0 }
 0xedb   : > { %v1067_v2 = vsel %vm122_vm0, %v1062_v31, 0.0  ;;  %v1063_v35 = vsel %vm495_vm2, %v1062_v31, 0.0 }
 0xedc   : > { %1068 = vadd.xlane.f32.xlu0 %v1067_v2  ;;  %1064 = vadd.xlane.f32.xlu1 %v1063_v35 }
 0xf46   : > { %v1043_v38 = vpop.xlane.xlu0 %1042 }
 0xf47   : > { %v1050_v40 = vmul.f32 %v1048_v29, %v1043_v38 }
 0xf49   : > { %v1058_v33 = vmul.f32 %v1056_v28, %v1050_v40 }
 0xf4b   : > { %v1060_v36 = vsub.f32 %v1031_v20, %v1058_v33 }
 0xf4d   : > { %v1066_v42 = vsel %vm1061_vm12, %v1060_v36, 0.0 }
 0xf4e   : > { %v1070_v45 = vsel %vm334_vm15, %v1066_v42, 0.0 }
 0xf4f   : > { %1071 = vadd.xlane.f32.xlu1 %v1070_v45 }
 0xf69   : > { %v1065_v46 = vpop.xlane.xlu1 %1064  ;;  %v1069_v53 = vpop.xlane.xlu0 %1068 }
 0xf6a   : > { %1571 = vrcp.f32 %v1065_v46  ;;  %v1419_v48 = vadd.f32 -1.0, %v1065_v46 }
 0xf6c   : > { %v1081_v51 = vsel %vm1061_vm12, %v1419_v48, %v1059_v6 }
 0xf6d   : > { %v1085_v54 = vrot.slane %v1081_v51, %v1890_v14 }
 0xf74   : > { %v1572_v50 = vpop.eup %1571 }
 0xf75   : > { %v1077_v52 = vrot.slane %v1572_v50, %v1890_v14 }
 0xf77   : > { %v1078_v55 = vmul.f32 %v1077_v52, %v1069_v53 }
 0xf79   : > { %v1086_v56 = vmul.f32 %v1085_v54, %v1078_v55 }
 0xf7b   : > { %v1088_v32 = vsub.f32 %v1059_v6, %v1086_v56 }
 0xf7d   : > { %v1091_v57 = vsel %vm1090_vm14, %v1088_v32, 0.0 }
 0xf7e   : > { %v1096_v21 = vsel %vm122_vm0, %v1091_v57, 0.0  ;;  %v1092_v5 = vsel %vm539_vm4, %v1091_v57, 0.0 }
 0xf7f   : > { %1097 = vadd.xlane.f32.xlu1 %v1096_v21  ;;  %1093 = vadd.xlane.f32.xlu0 %v1092_v5 }
 0xfdc   : > { %v1072_v58 = vpop.xlane.xlu1 %1071 }
 0xfdd   : > { %v1079_v59 = vmul.f32 %v1077_v52, %v1072_v58 }
 0xfdf   : > { %v1087_v60 = vmul.f32 %v1085_v54, %v1079_v59 }
 0xfe1   : > { %v1089_v61 = vsub.f32 %v1060_v36, %v1087_v60 }
 0xfe3   : > { %v1095_v39 = vsel %vm1090_vm14, %v1089_v61, 0.0 }
 0xfe4   : > { %v1099_v0 = vsel %vm334_vm15, %v1095_v39, 0.0 }
 0xfe5   : > { %1100 = vadd.xlane.f32.xlu0 %v1099_v0 }
0x100c   : > { %v1094_v3 = vpop.xlane.xlu0 %1093  ;;  %v1098_v47 = vpop.xlane.xlu1 %1097 }
0x100d   : > { %1573 = vrcp.f32 %v1094_v3  ;;  %v1420_v22 = vadd.f32 -1.0, %v1094_v3 }
0x100f   : > { %v1110_v7 = vsel %vm1090_vm14, %v1420_v22, %v1088_v32 }
0x1010   : > { %v1114_v9 = vrot.slane %v1110_v7, %v1927_v19 }
0x1017   : > { %v1574_v4 = vpop.eup %1573 }
0x1018   : > { %v1106_v8 = vrot.slane %v1574_v4, %v1927_v19 }
0x101a   : > { %v1107_v12 = vmul.f32 %v1106_v8, %v1098_v47 }
0x101c   : > { %v1115_v62 = vmul.f32 %v1114_v9, %v1107_v12 }
0x101e   : > { %v1117_v13 = vsub.f32 %v1088_v32, %v1115_v62 }
0x1020   : > { %v1120_v30 = vsel %vm1119_vm1, %v1117_v13, 0.0 }
0x1021   : > { %v1125_v15 = vsel %vm122_vm0, %v1120_v30, 0.0  ;;  %v1121_v17 = vsel %vm583_vm6, %v1120_v30, 0.0 }
0x1022   : > { %1126 = vadd.xlane.f32.xlu0 %v1125_v15  ;;  %1122 = vadd.xlane.f32.xlu1 %v1121_v17 }
0x1072   : > { %v1101_v18 = vpop.xlane.xlu0 %1100 }
0x1073   : > { %v1108_v20 = vmul.f32 %v1106_v8, %v1101_v18 }
0x1075   : > { %v1116_v23 = vmul.f32 %v1114_v9, %v1108_v20 }
0x1077   : > { %v1118_v41 = vsub.f32 %v1089_v61, %v1116_v23 }
0x1079   : > { %v1124_v24 = vsel %vm1119_vm1, %v1118_v41, 0.0 }
0x107a   : > { %v1128_v25 = vsel %vm334_vm15, %v1124_v24, 0.0 }
0x107b   : > { %1129 = vadd.xlane.f32.xlu1 %v1128_v25 }
0x10af   : > { %v1123_v44 = vpop.xlane.xlu1 %1122  ;;  %v1127_v43 = vpop.xlane.xlu0 %1126 }
0x10b0   : > { %1575 = vrcp.f32 %v1123_v44  ;;  %v1421_v26 = vadd.f32 -1.0, %v1123_v44 }
0x10b2   : > { %v1139_v27 = vsel %vm1119_vm1, %v1421_v26, %v1117_v13 }
0x10b3   : > { %v1143_v11 = vrot.slane %v1139_v27, %v1960_v10 }
0x10ba   : > { %v1576_v29 = vpop.eup %1575 }
0x10bb   : > { %v1135_v28 = vrot.slane %v1576_v29, %v1960_v10 }
0x10bd   : > { %v1136_v6 = vmul.f32 %v1135_v28, %v1127_v43 }
0x10bf   : > { %v1144_v31 = vmul.f32 %v1143_v11, %v1136_v6 }
0x10c1   : > { %v1146_v2 = vsub.f32 %v1117_v13, %v1144_v31 }
0x10c3   : > { %v1149_v35 = vsel %vm1148_vm3, %v1146_v2, 0.0 }
0x10c4   : > { %v1150_v38 = vsel %vm627_vm10, %v1149_v35, 0.0  ;;  %vm1171_vm10 = vcmp.eq.s32.totalorder %v1745_v49, 24 }
0x10c5   : > { %1151 = vadd.xlane.f32.xlu0 %v1150_v38 }
0x1108   : > { %v1130_v40 = vpop.xlane.xlu1 %1129 }
0x1109   : > { %v1137_v33 = vmul.f32 %v1135_v28, %v1130_v40 }
0x110b   : > { %v1145_v36 = vmul.f32 %v1143_v11, %v1137_v33 }
0x110d   : > { %v1147_v42 = vsub.f32 %v1118_v41, %v1145_v36 }
0x110f   : > { %v1153_v45 = vsel %vm1148_vm3, %v1147_v42, 0.0 }
0x1110   : > { %v1154_v10 = vsel %vm334_vm15, %v1153_v45, 0.0 }
0x1111   : > { %1155 = vadd.xlane.f32.xlu1 %v1154_v10 }
0x1152   : > { %v1152_v46 = vpop.xlane.xlu0 %1151 }
0x1153   : > { %1577 = vrcp.f32 %v1152_v46  ;;  %v1422_v48 = vadd.f32 -1.0, %v1152_v46 }
0x1155   : > { %v1164_v51 = vsel %vm1148_vm3, %v1422_v48, %v1146_v2 }
0x1156   : > { %v1168_v54 = vrot.slane %v1164_v51, %v1992_v1 }
0x115d   : > { %v1578_v50 = vpop.eup %1577 }
0x115e   : > { %v1161_v52 = vrot.slane %v1578_v50, %v1992_v1 }
0x119e   : > { %v1156_v53 = vpop.xlane.xlu1 %1155 }
0x119f   : > { %v1162_v55 = vmul.f32 %v1161_v52, %v1156_v53 }
0x11a1   : > { %v1169_v56 = vmul.f32 %v1168_v54, %v1162_v55 }
0x11a3   : > { %v1170_v32 = vsub.f32 %v1147_v42, %v1169_v56 }
0x11a5   : > { %v1172_v57 = vsel %vm1171_vm10, %v1170_v32, 0.0 }
0x11a6   : > { %v1176_v21 = vsel %vm334_vm15, %v1172_v57, 0.0  ;;  %v1173_v5 = vsel %vm318_vm7, %v1172_v57, 0.0  ;;  %vm1215_vm7 = vcmp.eq.s32.totalorder %v1745_v49, 26 }
0x11a7   : > { %1177 = vadd.xlane.f32.xlu1 %v1176_v21  ;;  %1174 = vadd.xlane.f32.xlu0 %v1173_v5 }
0x1234   : > { %v1175_v58 = vpop.xlane.xlu0 %1174  ;;  %v1178_v1 = vpop.xlane.xlu1 %1177 }
0x1235   : > { %1579 = vrcp.f32 %v1175_v58  ;;  %v1423_v59 = vadd.f32 -1.0, %v1175_v58 }
0x1237   : > { %v1186_v61 = vsel %vm1171_vm10, %v1423_v59, %v1170_v32 }
0x1238   : > { %v1190_v0 = vrot.slane %v1186_v61, %v1768_v16 }
0x123f   : > { %v1580_v60 = vpop.eup %1579 }
0x1240   : > { %v1183_v39 = vrot.slane %v1580_v60, %v1768_v16 }
0x1242   : > { %v1184_v3 = vmul.f32 %v1183_v39, %v1178_v1 }
0x1244   : > { %v1191_v22 = vmul.f32 %v1190_v0, %v1184_v3 }
0x1246   : > { %v1192_v4 = vsub.f32 %v1170_v32, %v1191_v22 }
0x1248   : > { %v1194_v7 = vsel %vm1193_vm5, %v1192_v4, 0.0 }
0x1249   : > { %v1198_v8 = vsel %vm334_vm15, %v1194_v7, 0.0  ;;  %v1195_v47 = vsel %vm363_vm9, %v1194_v7, 0.0  ;;  %vm1237_vm9 = vcmp.eq.s32.totalorder %v1745_v49, 27 }
0x124a   : > { %1199 = vadd.xlane.f32.xlu1 %v1198_v8  ;;  %1196 = vadd.xlane.f32.xlu0 %v1195_v47 }
0x12d7   : > { %v1197_v9 = vpop.xlane.xlu0 %1196  ;;  %v1200_v16 = vpop.xlane.xlu1 %1199 }
0x12d8   : > { %1581 = vrcp.f32 %v1197_v9  ;;  %v1424_v12 = vadd.f32 -1.0, %v1197_v9 }
0x12da   : > { %v1208_v13 = vsel %vm1193_vm5, %v1424_v12, %v1192_v4 }
0x12db   : > { %v1212_v15 = vrot.slane %v1208_v13, %v1791_v37 }
0x12e2   : > { %v1582_v62 = vpop.eup %1581 }
0x12e3   : > { %v1205_v30 = vrot.slane %v1582_v62, %v1791_v37 }
0x12e5   : > { %v1206_v17 = vmul.f32 %v1205_v30, %v1200_v16 }
0x12e7   : > { %v1213_v18 = vmul.f32 %v1212_v15, %v1206_v17 }
0x12e9   : > { %v1214_v20 = vsub.f32 %v1192_v4, %v1213_v18 }
0x12eb   : > { %v1216_v23 = vsel %vm1215_vm7, %v1214_v20, 0.0 }
0x12ec   : > { %v1220_v41 = vsel %vm334_vm15, %v1216_v23, 0.0  ;;  %v1217_v24 = vsel %vm407_vm11, %v1216_v23, 0.0  ;;  %vm1259_vm11 = vcmp.eq.s32.totalorder %v1745_v49, 28 }
0x12ed   : > { %1221 = vadd.xlane.f32.xlu1 %v1220_v41  ;;  %1218 = vadd.xlane.f32.xlu0 %v1217_v24 }
0x137a   : > { %v1219_v25 = vpop.xlane.xlu0 %1218  ;;  %v1222_v37 = vpop.xlane.xlu1 %1221 }
0x137b   : > { %1583 = vrcp.f32 %v1219_v25  ;;  %v1425_v44 = vadd.f32 -1.0, %v1219_v25 }
0x137d   : > { %v1230_v29 = vsel %vm1215_vm7, %v1425_v44, %v1214_v20 }
0x137e   : > { %v1234_v28 = vrot.slane %v1230_v29, %v1818_v63 }
0x1385   : > { %v1584_v26 = vpop.eup %1583 }
0x1386   : > { %v1227_v27 = vrot.slane %v1584_v26, %v1818_v63 }
0x1388   : > { %v1228_v43 = vmul.f32 %v1227_v27, %v1222_v37 }
0x138a   : > { %v1235_v11 = vmul.f32 %v1234_v28, %v1228_v43 }
0x138c   : > { %v1236_v6 = vsub.f32 %v1214_v20, %v1235_v11 }
0x138e   : > { %v1238_v31 = vsel %vm1237_vm9, %v1236_v6, 0.0 }
0x138f   : > { %v1242_v2 = vsel %vm334_vm15, %v1238_v31, 0.0  ;;  %v1239_v35 = vsel %vm451_vm13, %v1238_v31, 0.0  ;;  %vm1281_vm13 = vcmp.eq.s32.totalorder %v1745_v49, 29 }
0x1390   : > { %1243 = vadd.xlane.f32.xlu1 %v1242_v2  ;;  %1240 = vadd.xlane.f32.xlu0 %v1239_v35 }
0x141d   : > { %v1241_v38 = vpop.xlane.xlu0 %1240  ;;  %v1244_v63 = vpop.xlane.xlu1 %1243 }
0x141e   : > { %1585 = vrcp.f32 %v1241_v38  ;;  %v1426_v40 = vadd.f32 -1.0, %v1241_v38 }
0x1420   : > { %v1252_v36 = vsel %vm1237_vm9, %v1426_v40, %v1236_v6 }
0x1421   : > { %v1256_v45 = vrot.slane %v1252_v36, %v1853_v34 }
0x1428   : > { %v1586_v33 = vpop.eup %1585 }
0x1429   : > { %v1249_v42 = vrot.slane %v1586_v33, %v1853_v34 }
0x142b   : > { %v1250_v10 = vmul.f32 %v1249_v42, %v1244_v63 }
0x142d   : > { %v1257_v46 = vmul.f32 %v1256_v45, %v1250_v10 }
0x142f   : > { %v1258_v48 = vsub.f32 %v1236_v6, %v1257_v46 }
0x1431   : > { %v1260_v50 = vsel %vm1259_vm11, %v1258_v48, 0.0 }
0x1432   : > { %v1264_v51 = vsel %vm334_vm15, %v1260_v50, 0.0  ;;  %v1261_v52 = vsel %vm495_vm2, %v1260_v50, 0.0 }
0x1433   : > { %1265 = vadd.xlane.f32.xlu1 %v1264_v51  ;;  %1262 = vadd.xlane.f32.xlu0 %v1261_v52 }
0x14c0   : > { %v1263_v53 = vpop.xlane.xlu0 %1262  ;;  %v1266_v34 = vpop.xlane.xlu1 %1265 }
0x14c1   : > { %1587 = vrcp.f32 %v1263_v53  ;;  %v1427_v54 = vadd.f32 -1.0, %v1263_v53 }
0x14c3   : > { %v1274_v56 = vsel %vm1259_vm11, %v1427_v54, %v1258_v48 }
0x14c4   : > { %v1278_v57 = vrot.slane %v1274_v56, %v1890_v14 }
0x14cb   : > { %v1588_v55 = vpop.eup %1587 }
0x14cc   : > { %v1271_v32 = vrot.slane %v1588_v55, %v1890_v14 }
0x14ce   : > { %v1272_v21 = vmul.f32 %v1271_v32, %v1266_v34 }
0x14d0   : > { %v1279_v5 = vmul.f32 %v1278_v57, %v1272_v21 }
0x14d2   : > { %v1280_v58 = vsub.f32 %v1258_v48, %v1279_v5 }
0x14d4   : > { %v1282_v59 = vsel %vm1281_vm13, %v1280_v58, 0.0 }
0x14d5   : > { %v1286_v60 = vsel %vm334_vm15, %v1282_v59, 0.0  ;;  %v1283_v61 = vsel %vm539_vm4, %v1282_v59, 0.0 }
0x14d6   : > { %1287 = vadd.xlane.f32.xlu1 %v1286_v60  ;;  %1284 = vadd.xlane.f32.xlu0 %v1283_v61 }
0x1563   : > { %v1285_v39 = vpop.xlane.xlu0 %1284  ;;  %v1288_v14 = vpop.xlane.xlu1 %1287 }
0x1564   : > { %1589 = vrcp.f32 %v1285_v39  ;;  %v1428_v1 = vadd.f32 -1.0, %v1285_v39 }
0x1566   : > { %v1296_v3 = vsel %vm1281_vm13, %v1428_v1, %v1280_v58 }
0x1567   : > { %v1300_v49 = vrot.slane %v1296_v3, %v1927_v19 }
0x156e   : > { %v1590_v0 = vpop.eup %1589 }
0x156f   : > { %v1293_v22 = vrot.slane %v1590_v0, %v1927_v19 }
0x1571   : > { %v1294_v4 = vmul.f32 %v1293_v22, %v1288_v14 }
0x1573   : > { %v1301_v7 = vmul.f32 %v1300_v49, %v1294_v4 }
0x1575   : > { %v1302_v8 = vsub.f32 %v1280_v58, %v1301_v7 }
0x1577   : > { %v1303_v47 = vmul.f32 10.0, %v1302_v8 }
0x1579   : > { %v1304_v9 = vsel %vm583_vm6, %v1303_v47, -inf }
0x157a   : > { %1305 = vmax.xlane.f32.xlu0 %v1304_v9 }
0x1607   : > { %v1306_v12 = vpop.xlane.xlu0 %1305 }
0x1608   : > { %v1307_v62 = vsub.f32 %v1303_v47, %v1306_v12 }
0x160a   : > { %v1308_v13 = vmul.f32 1.442695, %v1307_v62 }
0x160c   : > { %1591 = vpow2.f32 %v1308_v13 }
0x1616   : > { %v1592_v30 = vpop.eup %1591 }
0x1617   : > { %v1310_v16 = vsel %vm583_vm6, %v1592_v30, 0.0 }
0x1618   : > { %1311 = vadd.xlane.f32.xlu1 %v1310_v16 }
0x16a5   : > { %v1312_v15 = vpop.xlane.xlu1 %1311 }
0x16a6   : > { %1593 = vrcp.f32 %v1312_v15 }
0x16b0   : > { %v1594_v19 = vpop.eup %1593 }
0x16b1   : > { %v1314_v17 = vmul.f32 %v1594_v19, %v1592_v30 }
0x16b3   : > { %v1315_v18 = vsel %vm122_vm0, %v1314_v17, 0.0 }
0x16b4   : > { %1316 = vst [vmem:[%s108_s25 - $0x6] sm:$0x40] %v1315_v18 }
0x16b5   : > { %1608 = shalt.err (!%p1605_p3)
}
0x16b6   : > { %s1609_s10 = scalar_lea.hbm %s2294_s29, 16  ;;  %s1613_s14 = scalar_lea.hbm %s2338_s1, 64 }
0x16b7   : > { %p1610_p4 = scmp.ne.s32.totalorder %s2294_s29, %s1609_s10  ;;  %p1614_p9 = scmp.lt.u32.totalorder %s2294_s29, %s2338_s1 }
0x16b8   : > { %p1615_p10 = scmp.lt.u32.totalorder %s1613_s14, %s1609_s10  ;;  %p1617_p12 = scmp.lt.u32.totalorder %s1609_s10, %s2294_s29 }
0x16b9   : > { %p1611_p7 = pnand %p1610_p4, %p1709_p5 }
0x16ba   : > { %p1616_p11 = por %p1615_p10, %p1614_p9 }
0x16bb   : > { %p1612_p8 = pneg %p1611_p7 }
0x16bc   : > { %p1618_p13 = por %p1617_p12, %p1616_p11 }
0x16be   : > { %p1619_p0 = pnand %p1618_p13, %p1612_p8 }
0x16c0   : > { %1622 = shalt.err (!%p1619_p0)
}
0x16c1   : > { %1491 = dma.vmem_to_hbm [thread:$0]  (%p1709_p5), %s2296_s26, 16, %s2294_s29, %s1318_s30  }
0x16c2 PF: > { %p1497_p1 = scmp.ge.s32.totalorder %s1657_s9, 2  ;;  %s1342_s20 = sand.u32 1, %s1645_s6  }
0x16c3   : > { %s1343_s21 = scalar_lea.sflag [#allocation3], %s1342_s20 }
0x16c4   : > { %p1494_p2 = pnand %p1497_p1, %p1713_p6 }
0x16c6   : > { %1640 = dma.done.wait (!%p1494_p2), %s1343_s21, 16  }
0x16c7   : > { %1642 = vsyncadd (!%p1494_p2), %s1343_s21, 4294967280  ;;  %p11_p3 = scmp.ge.s32.totalorder %s1696_s12, 6   ;;  %s2341_s6 = smov %s1649_s7 }
0x16c8   : > { %s2342_s7 = smov %s1653_s8  ;;  %s2343_s8 = smov %s1707_s15 }
0x16c9   : > { %s2344_s9 = smov %s1696_s12  ;;  %13 = sbr.rel (!%p11_p3) target bundleno = 3 (0x3), region = 59 }
0x16d0   :  { %1347 = vsyncpa [#allocation3], 1 }
0x16d1   :  { %1349 = vsyncpa [#allocation3 + $0x1], 1 }

</bundles_post_ra>
